<compile_context>
chip_gen: v7x
topology: tpu7x:2x2x1
jax: 0.10.0
libtpu: 0.0.40
codegen_flags: <defaults>
</compile_context>

<pallas_src>
import functools

import jax
import jax.numpy as jnp
from jax.experimental import pallas as pl
from jax.experimental.pallas import tpu as pltpu

_MIB = 1 << 20


def _round_up(n: int, m: int) -> int:
    return ((n + m - 1) // m) * m


def _pad_last(a, target: int):
    pad = target - a.shape[-1]
    if pad == 0:
        return a
    return jnp.pad(a, [(0, 0)] * (a.ndim - 1) + [(0, pad)])


def _device_vmem_bytes() -> int:
    """Physical per-core VMEM (128 MiB on v5e/v6e, 64 MiB on v7x); conservative fallback."""
    try:
        info = pltpu.get_tpu_info()
        cap = getattr(info, "vmem_capacity_bytes", None)
        if cap:
            return int(cap)
    except Exception:
        pass
    return 64 * _MIB  # safe on every generation


def prepare_gated_fusion_params(params, matmul_dtype=jnp.bfloat16, pad_input_dim_to=None):
    """One-time parameter prep (module init, NOT per forward call).

    `params` uses PyTorch nn.Linear convention:
      wx/wy: [dim, input_dim], bx/by: [dim], wo: [output_dim, dim], bo: [output_dim].
    Weights are transposed to [in, out], lane dims zero-padded to multiples of 128
    (exact -- padding columns contribute nothing), and cast to `matmul_dtype`
    (bf16 default: MXU-native, halves weight VMEM; use jnp.float32 for exactness).
    Biases stay f32 (bias add / sigmoid / gate multiply are f32 in-kernel).
    `pad_input_dim_to` optionally zero-pads the contraction dim (e.g. to 128) so the
    activation K is aligned; the wrapper pads x/y to match.
    """
    dim, input_dim = params["wx"].shape
    output_dim = params["wo"].shape[0]
    dim_p = _round_up(dim, 128)
    out_p = _round_up(output_dim, 128)
    in_p = _round_up(input_dim, pad_input_dim_to) if pad_input_dim_to else input_dim

    wx_t = jnp.pad(_pad_last(params["wx"].T.astype(matmul_dtype), dim_p),
                   ((0, in_p - input_dim), (0, 0)))                      # [in_p, dim_p]
    wy_t = jnp.pad(_pad_last(params["wy"].T.astype(matmul_dtype), dim_p),
                   ((0, in_p - input_dim), (0, 0)))                      # [in_p, dim_p]
    wo_t = jnp.pad(_pad_last(params["wo"].T.astype(matmul_dtype), out_p),
                   ((0, dim_p - dim), (0, 0)))                           # [dim_p, out_p]

    bx = _pad_last(params["bx"].reshape(1, dim).astype(jnp.float32), dim_p)
    by = _pad_last(params["by"].reshape(1, dim).astype(jnp.float32), dim_p)
    bo = _pad_last(params["bo"].reshape(1, output_dim).astype(jnp.float32), out_p)

    return {"wx_t": wx_t, "bx": bx, "wy_t": wy_t, "by": by, "wo_t": wo_t, "bo": bo,
            "dim": dim, "output_dim": output_dim}


def _gated_mul(out_x, out_y, x_gate: bool, approx_sigmoid: bool):
    t = out_x if x_gate else out_y
    if approx_sigmoid:
        # exp + approx reciprocal both land on the EUP slot (frees the VALU slot).
        g = pl.reciprocal(1.0 + jnp.exp(-t), approx=True)
    else:
        g = jax.nn.sigmoid(t)
    return g * (out_y if x_gate else out_x)


# ---------------- weight-resident kernel (all three weights live in VMEM) -------------
def _resident_kernel(x_ref, y_ref, wx_ref, bx_ref, wy_ref, by_ref, wo_ref, bo_ref,
                     *out_refs, x_gate: bool, emit_intermediates: bool,
                     approx_sigmoid: bool):
    mdt = wx_ref.dtype
    x = x_ref[...].astype(mdt)
    y = y_ref[...].astype(mdt)

    out_x = jnp.dot(x, wx_ref[...], preferred_element_type=jnp.float32) + bx_ref[...]
    out_y = jnp.dot(y, wy_ref[...], preferred_element_type=jnp.float32) + by_ref[...]
    fused = _gated_mul(out_x, out_y, x_gate, approx_sigmoid)
    out = jnp.dot(fused.astype(mdt), wo_ref[...],
                  preferred_element_type=jnp.float32) + bo_ref[...]

    if emit_intermediates:
        outx_ref, outy_ref, out_ref = out_refs
        outx_ref[...] = out_x.astype(outx_ref.dtype)
        outy_ref[...] = out_y.astype(outy_ref.dtype)
    else:
        (out_ref,) = out_refs
    out_ref[...] = out.astype(out_ref.dtype)


# -------- dim-tiled fallback kernel (weights streamed, fc_out accumulated) ------------
def _tiled_kernel(x_ref, y_ref, wx_ref, bx_ref, wy_ref, by_ref, wo_ref, bo_ref,
                  *refs, x_gate: bool, emit_intermediates: bool, approx_sigmoid: bool):
    if emit_intermediates:
        outx_ref, outy_ref, out_ref, acc_ref = refs
    else:
        out_ref, acc_ref = refs

    d = pl.program_id(1)

    @pl.when(d == 0)
    def _():
        acc_ref[...] = jnp.zeros_like(acc_ref)

    mdt = wx_ref.dtype
    x = x_ref[...].astype(mdt)
    y = y_ref[...].astype(mdt)

    out_x = jnp.dot(x, wx_ref[...], preferred_element_type=jnp.float32) + bx_ref[...]
    out_y = jnp.dot(y, wy_ref[...], preferred_element_type=jnp.float32) + by_ref[...]
    fused = _gated_mul(out_x, out_y, x_gate, approx_sigmoid)
    acc_ref[...] += jnp.dot(fused.astype(mdt), wo_ref[...],
                            preferred_element_type=jnp.float32)

    if emit_intermediates:
        outx_ref[...] = out_x.astype(outx_ref.dtype)
        outy_ref[...] = out_y.astype(outy_ref.dtype)

    @pl.when(d == pl.num_programs(1) - 1)
    def _():
        out_ref[...] = (acc_ref[...] + bo_ref[...]).astype(out_ref.dtype)


def gated_fusion(x, y, prepared, *, x_gate: bool = True,
                 return_intermediates: bool = False, intermediates_dtype=None,
                 block_b: int = 512, dim_block=None, force_tiled: bool = False,
                 approx_sigmoid: bool = False):
    """GatedFusion forward. Returns `output`, or (out_x, out_y, output) if
    return_intermediates=True (intermediates are ~2/3 of the HBM writeback -- drop
    them, or emit them as bf16 via intermediates_dtype, unless actually needed)."""
    wx_t, bx = prepared["wx_t"], prepared["bx"]
    wy_t, by = prepared["wy_t"], prepared["by"]
    wo_t, bo = prepared["wo_t"], prepared["bo"]
    dim, output_dim = prepared["dim"], prepared["output_dim"]
    in_p, dim_p = wx_t.shape
    out_p = wo_t.shape[1]

    B, input_dim = x.shape
    if input_dim != in_p:                       # prepare() padded the contraction dim
        x = _pad_last(x, in_p)
        y = _pad_last(y, in_p)
        input_dim = in_p

    act_itm = x.dtype.itemsize
    w_itm = wx_t.dtype.itemsize
    mid_dtype = intermediates_dtype if intermediates_dtype is not None else x.dtype
    mid_itm = jnp.dtype(mid_dtype).itemsize if return_intermediates else 0

    # ---------------- generation-aware VMEM budget ----------------
    budget = int(min(_device_vmem_bytes() - 8 * _MIB, 100 * _MIB))

    nbytes = lambda a: a.size * a.dtype.itemsize
    weight_bytes = (nbytes(wx_t) + nbytes(wy_t) + nbytes(wo_t)
                    + nbytes(bx) + nbytes(by) + nbytes(bo))

    # per-batch-row cost: double-buffered I/O tiles + in-kernel f32 temporaries
    # (out_x, out_y, fused, out) the compiler materializes alongside.
    row_io = 2 * (2 * input_dim * act_itm + out_p * act_itm
                  + (2 * dim_p * mid_itm if return_intermediates else 0))
    row_tmp = (3 * dim_p + out_p) * 4
    row_bytes = row_io + row_tmp

    def _pick_tb(avail_bytes, row_cost):
        if B <= 8:
            return B
        cap = max(8, (max(avail_bytes, 0) // max(row_cost, 1)) // 8 * 8)
        half = _round_up(pl.cdiv(B, 2), 8)   # >=2 grid steps -> both v7x TensorCores busy
        tb_ = min(block_b, cap, half)
        return max(8, (tb_ // 8) * 8)

    flops = 2 * B * (2 * input_dim * dim_p + dim_p * out_p)
    out_bytes = B * out_p * act_itm + (2 * B * dim_p * mid_itm if return_intermediates else 0)
    cost = pl.CostEstimate(
        flops=flops, transcendentals=B * dim_p,
        bytes_accessed=int(nbytes(x) + nbytes(y) + weight_bytes + out_bytes))

    resident_fits = weight_bytes + 8 * row_bytes + 4 * _MIB <= budget
    use_tiled = force_tiled or not resident_fits

    if not use_tiled:
        # ------------------- weight-resident path -------------------
        tb = _pick_tb(budget - weight_bytes - 4 * _MIB, row_bytes)
        grid = (pl.cdiv(B, tb),)

        def _call(single_buffer_weights):
            def const_spec(shape):
                idx = lambda i: (0, 0)
                if single_buffer_weights:
                    # block never changes -> single buffer (double-buffering only burns VMEM)
                    return pl.BlockSpec(shape, idx, pipeline_mode=pl.Buffered(1))
                return pl.BlockSpec(shape, idx)

            act_spec = pl.BlockSpec((tb, input_dim), lambda i: (i, 0))
            in_specs = [act_spec, act_spec,
                        const_spec((input_dim, dim_p)), const_spec((1, dim_p)),
                        const_spec((input_dim, dim_p)), const_spec((1, dim_p)),
                        const_spec((dim_p, out_p)), const_spec((1, out_p))]
            out_final = pl.BlockSpec((tb, out_p), lambda i: (i, 0))
            out_mid = pl.BlockSpec((tb, dim_p), lambda i: (i, 0))
            if return_intermediates:
                out_specs = (out_mid, out_mid, out_final)
                out_shape = (jax.ShapeDtypeStruct((B, dim_p), mid_dtype),
                             jax.ShapeDtypeStruct((B, dim_p), mid_dtype),
                             jax.ShapeDtypeStruct((B, out_p), x.dtype))
            else:
                out_specs = out_final
                out_shape = jax.ShapeDtypeStruct((B, out_p), x.dtype)

            wbuf = 1 if single_buffer_weights else 2
            needed = wbuf * weight_bytes + tb * row_bytes + 4 * _MIB
            vmem_limit = int(min(max(needed, 32 * _MIB), budget))

            kernel = functools.partial(_resident_kernel, x_gate=x_gate,
                                       emit_intermediates=return_intermediates,
                                       approx_sigmoid=approx_sigmoid)
            return pl.pallas_call(
                kernel, grid=grid, in_specs=in_specs, out_specs=out_specs,
                out_shape=out_shape,
                compiler_params=pltpu.CompilerParams(
                    dimension_semantics=("parallel",),
                    vmem_limit_bytes=vmem_limit),
                cost_estimate=cost,
            )(x, y, wx_t, bx, wy_t, by, wo_t, bo)

        if hasattr(pl, "Buffered"):
            try:
                results = _call(True)
            except Exception:          # older JAX without pipeline_mode support
                results = _call(False)
        else:
            results = _call(False)
    else:
        # --------- dim-tiled fallback: weights streamed, fc_out accumulated ---------
        def chunk_bytes(td_):  # double-buffered per-step weight/bias chunks
            return 2 * ((2 * input_dim * td_ + td_ * out_p) * w_itm
                        + 2 * td_ * 4 + out_p * 4)

        candidates = [c for c in range(128, dim_p + 1, 128) if dim_p % c == 0]
        td = 128
        for c in candidates:
            if chunk_bytes(c) + 8 * _MIB <= budget // 2:
                td = c
        if dim_block is not None:
            td = max(c for c in candidates if c <= max(128, dim_block))
        nd = dim_p // td

        row_io_t = (2 * (2 * input_dim * act_itm
                         + (2 * td * mid_itm if return_intermediates else 0))
                    + out_p * act_itm)
        row_tmp_t = (3 * td + out_p) * 4 + out_p * 4     # f32 temporaries + acc scratch
        row_bytes_t = row_io_t + row_tmp_t

        tb = _pick_tb(budget - chunk_bytes(td) - 4 * _MIB, row_bytes_t)
        grid = (pl.cdiv(B, tb), nd)
        needed = chunk_bytes(td) + tb * row_bytes_t + 4 * _MIB
        vmem_limit = int(min(max(needed, 32 * _MIB), budget))

        in_specs = [
            pl.BlockSpec((tb, input_dim), lambda i, d: (i, 0)),    # x
            pl.BlockSpec((tb, input_dim), lambda i, d: (i, 0)),    # y
            pl.BlockSpec((input_dim, td), lambda i, d: (0, d)),    # wx chunk
            pl.BlockSpec((1, td), lambda i, d: (0, d)),            # bx chunk
            pl.BlockSpec((input_dim, td), lambda i, d: (0, d)),    # wy chunk
            pl.BlockSpec((1, td), lambda i, d: (0, d)),            # by chunk
            pl.BlockSpec((td, out_p), lambda i, d: (d, 0)),        # wo chunk
            pl.BlockSpec((1, out_p), lambda i, d: (0, 0)),         # bo
        ]
        out_final = pl.BlockSpec((tb, out_p), lambda i, d: (i, 0))
        out_mid = pl.BlockSpec((tb, td), lambda i, d: (i, d))
        if return_intermediates:
            out_specs = (out_mid, out_mid, out_final)
            out_shape = (jax.ShapeDtypeStruct((B, dim_p), mid_dtype),
                         jax.ShapeDtypeStruct((B, dim_p), mid_dtype),
                         jax.ShapeDtypeStruct((B, out_p), x.dtype))
        else:
            out_specs = out_final
            out_shape = jax.ShapeDtypeStruct((B, out_p), x.dtype)

        kernel = functools.partial(_tiled_kernel, x_gate=x_gate,
                                   emit_intermediates=return_intermediates,
                                   approx_sigmoid=approx_sigmoid)
        results = pl.pallas_call(
            kernel, grid=grid, in_specs=in_specs, out_specs=out_specs,
            out_shape=out_shape,
            scratch_shapes=[pltpu.VMEM((tb, out_p), jnp.float32)],
            compiler_params=pltpu.CompilerParams(
                dimension_semantics=("parallel", "arbitrary"),
                vmem_limit_bytes=vmem_limit),
            cost_estimate=cost,
        )(x, y, wx_t, bx, wy_t, by, wo_t, bo)

    if return_intermediates:
        out_x_p, out_y_p, out_full = results
        return out_x_p[:, :dim], out_y_p[:, :dim], out_full[:, :output_dim]
    return results[:, :output_dim]


def gated_fusion_forward(x, y, prepared, **kw):
    """Module-equivalent forward: returns (out_x, out_y, output) like GatedFusion.forward."""
    kw.pop("return_intermediates", None)
    return gated_fusion(x, y, prepared, return_intermediates=True, **kw)


def _reference(x, y, params, *, x_gate=True):
    out_x = x @ params["wx"].T + params["bx"]
    out_y = y @ params["wy"].T + params["by"]
    if x_gate:
        fused = jax.nn.sigmoid(out_x) * out_y
    else:
        fused = out_x * jax.nn.sigmoid(out_y)
    output = fused @ params["wo"].T + params["bo"]
    return out_x, out_y, output


if __name__ == "__main__":
    # Small shapes consistent with GatedFusion(input_dim, dim, output_dim).
    B, input_dim, dim, output_dim = 16, 32, 32, 16
    key = jax.random.PRNGKey(0)
    ks = jax.random.split(key, 8)
    params = {
        "wx": jax.random.normal(ks[0], (dim, input_dim), jnp.float32) * 0.05,
        "bx": jax.random.normal(ks[1], (dim,), jnp.float32) * 0.05,
        "wy": jax.random.normal(ks[2], (dim, input_dim), jnp.float32) * 0.05,
        "by": jax.random.normal(ks[3], (dim,), jnp.float32) * 0.05,
        "wo": jax.random.normal(ks[4], (output_dim, dim), jnp.float32) * 0.05,
        "bo": jax.random.normal(ks[5], (output_dim,), jnp.float32) * 0.05,
    }
    x = jax.random.normal(ks[6], (B, input_dim), jnp.float32)
    y = jax.random.normal(ks[7], (B, input_dim), jnp.float32)
    ref_x, ref_y, ref_o = _reference(x, y, params, x_gate=True)

    # 1) exact f32 weight-resident path, module semantics (out_x, out_y, output)
    prep_f32 = prepare_gated_fusion_params(params, matmul_dtype=jnp.float32)
    out_x, out_y, output = gated_fusion_forward(x, y, prep_f32, x_gate=True)
    jax.block_until_ready((out_x, out_y, output))
    assert jnp.allclose(out_x, ref_x, atol=1e-5, rtol=1e-5)
    assert jnp.allclose(out_y, ref_y, atol=1e-5, rtol=1e-5)
    assert jnp.allclose(output, ref_o, atol=1e-5, rtol=1e-5)

    # 2) output-only path (drops the two (B, dim) intermediate writebacks)
    out_only = gated_fusion(x, y, prep_f32, x_gate=True)
    jax.block_until_ready(out_only)
    assert jnp.allclose(out_only, ref_o, atol=1e-5, rtol=1e-5)

    # 3) bf16 weights (prepare default) + bf16 intermediates: fast path
    prep_bf16 = prepare_gated_fusion_params(params)
    bx16, by16, bo16 = gated_fusion_forward(x, y, prep_bf16, x_gate=True,
                                            intermediates_dtype=jnp.bfloat16)
    jax.block_until_ready((bx16, by16, bo16))
    assert jnp.allclose(bx16.astype(jnp.float32), ref_x, atol=1e-1, rtol=1e-1)
    assert jnp.allclose(by16.astype(jnp.float32), ref_y, atol=1e-1, rtol=1e-1)
    assert jnp.allclose(bo16.astype(jnp.float32), ref_o, atol=1e-1, rtol=1e-1)

    # 4) dim-tiled fallback (for weights too large to stay VMEM-resident), forced here
    #    on a small problem so both grid axes have >= 2 steps.
    B2, in2, dim2, out2 = 16, 64, 256, 128
    k2 = jax.random.split(jax.random.PRNGKey(1), 8)
    params2 = {
        "wx": jax.random.normal(k2[0], (dim2, in2), jnp.float32) * 0.05,
        "bx": jax.random.normal(k2[1], (dim2,), jnp.float32) * 0.05,
        "wy": jax.random.normal(k2[2], (dim2, in2), jnp.float32) * 0.05,
        "by": jax.random.normal(k2[3], (dim2,), jnp.float32) * 0.05,
        "wo": jax.random.normal(k2[4], (out2, dim2), jnp.float32) * 0.05,
        "bo": jax.random.normal(k2[5], (out2,), jnp.float32) * 0.05,
    }
    x2 = jax.random.normal(k2[6], (B2, in2), jnp.float32)
    y2 = jax.random.normal(k2[7], (B2, in2), jnp.float32)
    r2x, r2y, r2o = _reference(x2, y2, params2, x_gate=True)
    prep2 = prepare_gated_fusion_params(params2, matmul_dtype=jnp.float32)
    t2x, t2y, t2o = gated_fusion_forward(x2, y2, prep2, x_gate=True,
                                         force_tiled=True, dim_block=128)
    jax.block_until_ready((t2x, t2y, t2o))
    assert jnp.allclose(t2x, r2x, atol=1e-4, rtol=1e-4)
    assert jnp.allclose(t2y, r2y, atol=1e-4, rtol=1e-4)
    assert jnp.allclose(t2o, r2o, atol=1e-4, rtol=1e-4)

    # 5) x_gate=False branch
    rfx, rfy, rfo = _reference(x, y, params, x_gate=False)
    fo = gated_fusion(x, y, prep_f32, x_gate=False)
    jax.block_until_ready(fo)
    assert jnp.allclose(fo, rfo, atol=1e-5, rtol=1e-5)

    print("KERNEL_OK")
</pallas_src>

<mosaic_0001>
module attributes {stable_mosaic.version = 11 : i64} {
  func.func @_resident_kernel(%arg0: i32, %arg1: memref<8x32xf32, #tpu.memory_space<vmem>>, %arg2: memref<8x32xf32, #tpu.memory_space<vmem>>, %arg3: memref<32x128xf32, #tpu.memory_space<vmem>>, %arg4: memref<1x128xf32, #tpu.memory_space<vmem>>, %arg5: memref<32x128xf32, #tpu.memory_space<vmem>>, %arg6: memref<1x128xf32, #tpu.memory_space<vmem>>, %arg7: memref<128x128xf32, #tpu.memory_space<vmem>>, %arg8: memref<1x128xf32, #tpu.memory_space<vmem>>, %arg9: memref<8x128xf32, #tpu.memory_space<vmem>>, %arg10: memref<8x128xf32, #tpu.memory_space<vmem>>, %arg11: memref<8x128xf32, #tpu.memory_space<vmem>>) attributes {dimension_semantics = [#tpu.dimension_semantics<parallel>], iteration_bounds = array<i64: 2>, scalar_prefetch = 0 : i64, scratch_operands = 0 : i64, tpu.core_type = #tpu.core_type<tc>, window_params = [{transform_indices = @transform_0, window_bounds = array<i64: 8, 32>}, {transform_indices = @transform_1, window_bounds = array<i64: 8, 32>}, {pipeline_mode = #tpu.pipeline_mode<synchronous>, transform_indices = @transform_2, window_bounds = array<i64: 32, 128>}, {pipeline_mode = #tpu.pipeline_mode<synchronous>, transform_indices = @transform_3, window_bounds = array<i64: 1, 128>}, {pipeline_mode = #tpu.pipeline_mode<synchronous>, transform_indices = @transform_4, window_bounds = array<i64: 32, 128>}, {pipeline_mode = #tpu.pipeline_mode<synchronous>, transform_indices = @transform_5, window_bounds = array<i64: 1, 128>}, {pipeline_mode = #tpu.pipeline_mode<synchronous>, transform_indices = @transform_6, window_bounds = array<i64: 128, 128>}, {pipeline_mode = #tpu.pipeline_mode<synchronous>, transform_indices = @transform_7, window_bounds = array<i64: 1, 128>}, {transform_indices = @transform_8, window_bounds = array<i64: 8, 128>}, {transform_indices = @transform_9, window_bounds = array<i64: 8, 128>}, {transform_indices = @transform_10, window_bounds = array<i64: 8, 128>}]} {
    %c0 = arith.constant 0 : index
    %c0_0 = arith.constant 0 : index
    %0 = vector.load %arg1[%c0, %c0_0] : memref<8x32xf32, #tpu.memory_space<vmem>>, vector<8x32xf32>
    %c0_1 = arith.constant 0 : index
    %c0_2 = arith.constant 0 : index
    %1 = vector.load %arg2[%c0_1, %c0_2] : memref<8x32xf32, #tpu.memory_space<vmem>>, vector<8x32xf32>
    %c0_3 = arith.constant 0 : index
    %c0_4 = arith.constant 0 : index
    %2 = vector.load %arg3[%c0_3, %c0_4] : memref<32x128xf32, #tpu.memory_space<vmem>>, vector<32x128xf32>
    %cst = arith.constant dense<0.000000e+00> : vector<8x128xf32>
    %3 = tpu.matmul %0, %2, %cst {dimension_numbers = #tpu.dot_dimension_numbers<[1], [0], [0], [1], [0, 0, 1, 1], [], []>} : vector<8x32xf32>, vector<32x128xf32>, vector<8x128xf32> -> vector<8x128xf32>
    %c0_5 = arith.constant 0 : index
    %c0_6 = arith.constant 0 : index
    %4 = vector.load %arg4[%c0_5, %c0_6] : memref<1x128xf32, #tpu.memory_space<vmem>>, vector<1x128xf32>
    %5 = vector.broadcast %4 : vector<1x128xf32> to vector<8x128xf32>
    %6 = arith.addf %3, %5 : vector<8x128xf32>
    %c0_7 = arith.constant 0 : index
    %c0_8 = arith.constant 0 : index
    %7 = vector.load %arg5[%c0_7, %c0_8] : memref<32x128xf32, #tpu.memory_space<vmem>>, vector<32x128xf32>
    %cst_9 = arith.constant dense<0.000000e+00> : vector<8x128xf32>
    %8 = tpu.matmul %1, %7, %cst_9 {dimension_numbers = #tpu.dot_dimension_numbers<[1], [0], [0], [1], [0, 0, 1, 1], [], []>} : vector<8x32xf32>, vector<32x128xf32>, vector<8x128xf32> -> vector<8x128xf32>
    %c0_10 = arith.constant 0 : index
    %c0_11 = arith.constant 0 : index
    %9 = vector.load %arg6[%c0_10, %c0_11] : memref<1x128xf32, #tpu.memory_space<vmem>>, vector<1x128xf32>
    %10 = vector.broadcast %9 : vector<1x128xf32> to vector<8x128xf32>
    %11 = arith.addf %8, %10 : vector<8x128xf32>
    %12 = arith.negf %6 : vector<8x128xf32>
    %13 = math.exp %12 : vector<8x128xf32>
    %cst_12 = arith.constant 1.000000e+00 : f32
    %14 = vector.broadcast %cst_12 : f32 to vector<8x128xf32>
    %15 = arith.addf %14, %13 : vector<8x128xf32>
    %16 = arith.divf %14, %15 : vector<8x128xf32>
    %17 = arith.mulf %16, %11 : vector<8x128xf32>
    %c0_13 = arith.constant 0 : index
    %c0_14 = arith.constant 0 : index
    %18 = vector.load %arg7[%c0_13, %c0_14] : memref<128x128xf32, #tpu.memory_space<vmem>>, vector<128x128xf32>
    %cst_15 = arith.constant dense<0.000000e+00> : vector<8x128xf32>
    %19 = tpu.matmul %17, %18, %cst_15 {dimension_numbers = #tpu.dot_dimension_numbers<[1], [0], [0], [1], [0, 0, 1, 1], [], []>} : vector<8x128xf32>, vector<128x128xf32>, vector<8x128xf32> -> vector<8x128xf32>
    %c0_16 = arith.constant 0 : index
    %c0_17 = arith.constant 0 : index
    %20 = vector.load %arg8[%c0_16, %c0_17] : memref<1x128xf32, #tpu.memory_space<vmem>>, vector<1x128xf32>
    %21 = vector.broadcast %20 : vector<1x128xf32> to vector<8x128xf32>
    %22 = arith.addf %19, %21 : vector<8x128xf32>
    %c0_18 = arith.constant 0 : index
    %c0_19 = arith.constant 0 : index
    %23 = vector.load %arg9[%c0_18, %c0_19] : memref<8x128xf32, #tpu.memory_space<vmem>>, vector<8x128xf32>
    tpu.vector_store %arg9[%c0_18, %c0_19], %6 {strides = array<i32>} : memref<8x128xf32, #tpu.memory_space<vmem>>, vector<8x128xf32>,
    %c0_20 = arith.constant 0 : index
    %c0_21 = arith.constant 0 : index
    %24 = vector.load %arg10[%c0_20, %c0_21] : memref<8x128xf32, #tpu.memory_space<vmem>>, vector<8x128xf32>
    tpu.vector_store %arg10[%c0_20, %c0_21], %11 {strides = array<i32>} : memref<8x128xf32, #tpu.memory_space<vmem>>, vector<8x128xf32>,
    %c0_22 = arith.constant 0 : index
    %c0_23 = arith.constant 0 : index
    %25 = vector.load %arg11[%c0_22, %c0_23] : memref<8x128xf32, #tpu.memory_space<vmem>>, vector<8x128xf32>
    tpu.vector_store %arg11[%c0_22, %c0_23], %22 {strides = array<i32>} : memref<8x128xf32, #tpu.memory_space<vmem>>, vector<8x128xf32>,
    return
  }
  func.func @transform_0(%arg0: i32) -> (i32, i32) {
    %c0_i32 = arith.constant 0 : i32
    %c0_i32_0 = arith.constant 0 : i32
    return %arg0, %c0_i32 : i32, i32
  }
  func.func @transform_1(%arg0: i32) -> (i32, i32) {
    %c0_i32 = arith.constant 0 : i32
    %c0_i32_0 = arith.constant 0 : i32
    return %arg0, %c0_i32 : i32, i32
  }
  func.func @transform_2(%arg0: i32) -> (i32, i32) {
    %c0_i32 = arith.constant 0 : i32
    %c0_i32_0 = arith.constant 0 : i32
    %c0_i32_1 = arith.constant 0 : i32
    return %c0_i32, %c0_i32_0 : i32, i32
  }
  func.func @transform_3(%arg0: i32) -> (i32, i32) {
    %c0_i32 = arith.constant 0 : i32
    %c0_i32_0 = arith.constant 0 : i32
    %c0_i32_1 = arith.constant 0 : i32
    return %c0_i32, %c0_i32_0 : i32, i32
  }
  func.func @transform_4(%arg0: i32) -> (i32, i32) {
    %c0_i32 = arith.constant 0 : i32
    %c0_i32_0 = arith.constant 0 : i32
    %c0_i32_1 = arith.constant 0 : i32
    return %c0_i32, %c0_i32_0 : i32, i32
  }
  func.func @transform_5(%arg0: i32) -> (i32, i32) {
    %c0_i32 = arith.constant 0 : i32
    %c0_i32_0 = arith.constant 0 : i32
    %c0_i32_1 = arith.constant 0 : i32
    return %c0_i32, %c0_i32_0 : i32, i32
  }
  func.func @transform_6(%arg0: i32) -> (i32, i32) {
    %c0_i32 = arith.constant 0 : i32
    %c0_i32_0 = arith.constant 0 : i32
    %c0_i32_1 = arith.constant 0 : i32
    return %c0_i32, %c0_i32_0 : i32, i32
  }
  func.func @transform_7(%arg0: i32) -> (i32, i32) {
    %c0_i32 = arith.constant 0 : i32
    %c0_i32_0 = arith.constant 0 : i32
    %c0_i32_1 = arith.constant 0 : i32
    return %c0_i32, %c0_i32_0 : i32, i32
  }
  func.func @transform_8(%arg0: i32) -> (i32, i32) {
    %c0_i32 = arith.constant 0 : i32
    %c0_i32_0 = arith.constant 0 : i32
    return %arg0, %c0_i32 : i32, i32
  }
  func.func @transform_9(%arg0: i32) -> (i32, i32) {
    %c0_i32 = arith.constant 0 : i32
    %c0_i32_0 = arith.constant 0 : i32
    return %arg0, %c0_i32 : i32, i32
  }
  func.func @transform_10(%arg0: i32) -> (i32, i32) {
    %c0_i32 = arith.constant 0 : i32
    %c0_i32_0 = arith.constant 0 : i32
    return %arg0, %c0_i32 : i32, i32
  }
}

module attributes {stable_mosaic.version = 11 : i64} {
  func.func @_resident_kernel(%arg0: i32, %arg1: memref<8x32xf32, #tpu.memory_space<vmem>>, %arg2: memref<8x32xf32, #tpu.memory_space<vmem>>, %arg3: memref<32x128xf32, #tpu.memory_space<vmem>>, %arg4: memref<1x128xf32, #tpu.memory_space<vmem>>, %arg5: memref<32x128xf32, #tpu.memory_space<vmem>>, %arg6: memref<1x128xf32, #tpu.memory_space<vmem>>, %arg7: memref<128x128xf32, #tpu.memory_space<vmem>>, %arg8: memref<1x128xf32, #tpu.memory_space<vmem>>, %arg9: memref<8x128xf32, #tpu.memory_space<vmem>>, %arg10: memref<8x128xf32, #tpu.memory_space<vmem>>, %arg11: memref<8x128xf32, #tpu.memory_space<vmem>>) attributes {dimension_semantics = [#tpu.dimension_semantics<parallel>], iteration_bounds = array<i64: 2>, scalar_prefetch = 0 : i64, scratch_operands = 0 : i64, tpu.core_type = #tpu.core_type<tc>, window_params = [{transform_indices = @transform_0, window_bounds = array<i64: 8, 32>}, {transform_indices = @transform_1, window_bounds = array<i64: 8, 32>}, {pipeline_mode = #tpu.pipeline_mode<synchronous>, transform_indices = @transform_2, window_bounds = array<i64: 32, 128>}, {pipeline_mode = #tpu.pipeline_mode<synchronous>, transform_indices = @transform_3, window_bounds = array<i64: 1, 128>}, {pipeline_mode = #tpu.pipeline_mode<synchronous>, transform_indices = @transform_4, window_bounds = array<i64: 32, 128>}, {pipeline_mode = #tpu.pipeline_mode<synchronous>, transform_indices = @transform_5, window_bounds = array<i64: 1, 128>}, {pipeline_mode = #tpu.pipeline_mode<synchronous>, transform_indices = @transform_6, window_bounds = array<i64: 128, 128>}, {pipeline_mode = #tpu.pipeline_mode<synchronous>, transform_indices = @transform_7, window_bounds = array<i64: 1, 128>}, {transform_indices = @transform_8, window_bounds = array<i64: 8, 128>}, {transform_indices = @transform_9, window_bounds = array<i64: 8, 128>}, {transform_indices = @transform_10, window_bounds = array<i64: 8, 128>}]} {
    %c0 = arith.constant 0 : index
    %c0_0 = arith.constant 0 : index
    %0 = vector.load %arg1[%c0, %c0_0] : memref<8x32xf32, #tpu.memory_space<vmem>>, vector<8x32xf32>
    %c0_1 = arith.constant 0 : index
    %c0_2 = arith.constant 0 : index
    %1 = vector.load %arg2[%c0_1, %c0_2] : memref<8x32xf32, #tpu.memory_space<vmem>>, vector<8x32xf32>
    %c0_3 = arith.constant 0 : index
    %c0_4 = arith.constant 0 : index
    %2 = vector.load %arg3[%c0_3, %c0_4] : memref<32x128xf32, #tpu.memory_space<vmem>>, vector<32x128xf32>
    %cst = arith.constant dense<0.000000e+00> : vector<8x128xf32>
    %3 = tpu.matmul %0, %2, %cst {dimension_numbers = #tpu.dot_dimension_numbers<[1], [0], [0], [1], [0, 0, 1, 1], [], []>} : vector<8x32xf32>, vector<32x128xf32>, vector<8x128xf32> -> vector<8x128xf32>
    %c0_5 = arith.constant 0 : index
    %c0_6 = arith.constant 0 : index
    %4 = vector.load %arg4[%c0_5, %c0_6] : memref<1x128xf32, #tpu.memory_space<vmem>>, vector<1x128xf32>
    %5 = vector.broadcast %4 : vector<1x128xf32> to vector<8x128xf32>
    %6 = arith.addf %3, %5 : vector<8x128xf32>
    %c0_7 = arith.constant 0 : index
    %c0_8 = arith.constant 0 : index
    %7 = vector.load %arg5[%c0_7, %c0_8] : memref<32x128xf32, #tpu.memory_space<vmem>>, vector<32x128xf32>
    %cst_9 = arith.constant dense<0.000000e+00> : vector<8x128xf32>
    %8 = tpu.matmul %1, %7, %cst_9 {dimension_numbers = #tpu.dot_dimension_numbers<[1], [0], [0], [1], [0, 0, 1, 1], [], []>} : vector<8x32xf32>, vector<32x128xf32>, vector<8x128xf32> -> vector<8x128xf32>
    %c0_10 = arith.constant 0 : index
    %c0_11 = arith.constant 0 : index
    %9 = vector.load %arg6[%c0_10, %c0_11] : memref<1x128xf32, #tpu.memory_space<vmem>>, vector<1x128xf32>
    %10 = vector.broadcast %9 : vector<1x128xf32> to vector<8x128xf32>
    %11 = arith.addf %8, %10 : vector<8x128xf32>
    %12 = arith.negf %6 : vector<8x128xf32>
    %13 = math.exp %12 : vector<8x128xf32>
    %cst_12 = arith.constant 1.000000e+00 : f32
    %14 = vector.broadcast %cst_12 : f32 to vector<8x128xf32>
    %15 = arith.addf %14, %13 : vector<8x128xf32>
    %16 = arith.divf %14, %15 : vector<8x128xf32>
    %17 = arith.mulf %16, %11 : vector<8x128xf32>
    %c0_13 = arith.constant 0 : index
    %c0_14 = arith.constant 0 : index
    %18 = vector.load %arg7[%c0_13, %c0_14] : memref<128x128xf32, #tpu.memory_space<vmem>>, vector<128x128xf32>
    %cst_15 = arith.constant dense<0.000000e+00> : vector<8x128xf32>
    %19 = tpu.matmul %17, %18, %cst_15 {dimension_numbers = #tpu.dot_dimension_numbers<[1], [0], [0], [1], [0, 0, 1, 1], [], []>} : vector<8x128xf32>, vector<128x128xf32>, vector<8x128xf32> -> vector<8x128xf32>
    %c0_16 = arith.constant 0 : index
    %c0_17 = arith.constant 0 : index
    %20 = vector.load %arg8[%c0_16, %c0_17] : memref<1x128xf32, #tpu.memory_space<vmem>>, vector<1x128xf32>
    %21 = vector.broadcast %20 : vector<1x128xf32> to vector<8x128xf32>
    %22 = arith.addf %19, %21 : vector<8x128xf32>
    %c0_18 = arith.constant 0 : index
    %c0_19 = arith.constant 0 : index
    %23 = vector.load %arg9[%c0_18, %c0_19] : memref<8x128xf32, #tpu.memory_space<vmem>>, vector<8x128xf32>
    tpu.vector_store %arg9[%c0_18, %c0_19], %6 {strides = array<i32>} : memref<8x128xf32, #tpu.memory_space<vmem>>, vector<8x128xf32>,
    %c0_20 = arith.constant 0 : index
    %c0_21 = arith.constant 0 : index
    %24 = vector.load %arg10[%c0_20, %c0_21] : memref<8x128xf32, #tpu.memory_space<vmem>>, vector<8x128xf32>
    tpu.vector_store %arg10[%c0_20, %c0_21], %11 {strides = array<i32>} : memref<8x128xf32, #tpu.memory_space<vmem>>, vector<8x128xf32>,
    %c0_22 = arith.constant 0 : index
    %c0_23 = arith.constant 0 : index
    %25 = vector.load %arg11[%c0_22, %c0_23] : memref<8x128xf32, #tpu.memory_space<vmem>>, vector<8x128xf32>
    tpu.vector_store %arg11[%c0_22, %c0_23], %22 {strides = array<i32>} : memref<8x128xf32, #tpu.memory_space<vmem>>, vector<8x128xf32>,
    return
  }
  func.func @transform_0(%arg0: i32) -> (i32, i32) {
    %c0_i32 = arith.constant 0 : i32
    %c0_i32_0 = arith.constant 0 : i32
    return %arg0, %c0_i32 : i32, i32
  }
  func.func @transform_1(%arg0: i32) -> (i32, i32) {
    %c0_i32 = arith.constant 0 : i32
    %c0_i32_0 = arith.constant 0 : i32
    return %arg0, %c0_i32 : i32, i32
  }
  func.func @transform_2(%arg0: i32) -> (i32, i32) {
    %c0_i32 = arith.constant 0 : i32
    %c0_i32_0 = arith.constant 0 : i32
    %c0_i32_1 = arith.constant 0 : i32
    return %c0_i32, %c0_i32_0 : i32, i32
  }
  func.func @transform_3(%arg0: i32) -> (i32, i32) {
    %c0_i32 = arith.constant 0 : i32
    %c0_i32_0 = arith.constant 0 : i32
    %c0_i32_1 = arith.constant 0 : i32
    return %c0_i32, %c0_i32_0 : i32, i32
  }
  func.func @transform_4(%arg0: i32) -> (i32, i32) {
    %c0_i32 = arith.constant 0 : i32
    %c0_i32_0 = arith.constant 0 : i32
    %c0_i32_1 = arith.constant 0 : i32
    return %c0_i32, %c0_i32_0 : i32, i32
  }
  func.func @transform_5(%arg0: i32) -> (i32, i32) {
    %c0_i32 = arith.constant 0 : i32
    %c0_i32_0 = arith.constant 0 : i32
    %c0_i32_1 = arith.constant 0 : i32
    return %c0_i32, %c0_i32_0 : i32, i32
  }
  func.func @transform_6(%arg0: i32) -> (i32, i32) {
    %c0_i32 = arith.constant 0 : i32
    %c0_i32_0 = arith.constant 0 : i32
    %c0_i32_1 = arith.constant 0 : i32
    return %c0_i32, %c0_i32_0 : i32, i32
  }
  func.func @transform_7(%arg0: i32) -> (i32, i32) {
    %c0_i32 = arith.constant 0 : i32
    %c0_i32_0 = arith.constant 0 : i32
    %c0_i32_1 = arith.constant 0 : i32
    return %c0_i32, %c0_i32_0 : i32, i32
  }
  func.func @transform_8(%arg0: i32) -> (i32, i32) {
    %c0_i32 = arith.constant 0 : i32
    %c0_i32_0 = arith.constant 0 : i32
    return %arg0, %c0_i32 : i32, i32
  }
  func.func @transform_9(%arg0: i32) -> (i32, i32) {
    %c0_i32 = arith.constant 0 : i32
    %c0_i32_0 = arith.constant 0 : i32
    return %arg0, %c0_i32 : i32, i32
  }
  func.func @transform_10(%arg0: i32) -> (i32, i32) {
    %c0_i32 = arith.constant 0 : i32
    %c0_i32_0 = arith.constant 0 : i32
    return %arg0, %c0_i32 : i32, i32
  }
}

</mosaic_0001>

<bundles_post_ra>
// kernel: tpu_custom_call.1
= control target key start
LH: loop header
LB: loop body
LE: loop exit
PB: predicated region body
PF: predicated region fallthrough
CT: control target
= control target key end

     0   :  { %s1974_s0 = inlined_call_operand.hbm [shape: f32[16,32], index: 0, kind: input, shape index: {}]   ;;  %s1975_s1 = inlined_call_operand.hbm [shape: f32[16,32], index: 1, kind: input, shape index: {}]   ;;  %s1976_s2 = inlined_call_operand.hbm [shape: f32[32,128], index: 2, kind: input, shape index: {}]   ;;  %s1977_s3 = inlined_call_operand.vmem [shape: f32[1,128], index: 3, kind: input, shape index: {}]   ;;  %s1978_s4 = inlined_call_operand.hbm [shape: f32[32,128], index: 4, kind: input, shape index: {}]   ;;  %s1979_s5 = inlined_call_operand.vmem [shape: f32[1,128], index: 5, kind: input, shape index: {}]   ;;  %s1980_s6 = inlined_call_operand.hbm [shape: f32[128,128], index: 6, kind: input, shape index: {}]   ;;  %s1981_s7 = inlined_call_operand.vmem [shape: f32[1,128], index: 7, kind: input, shape index: {}]   ;;  %s1982_s8 = inlined_call_operand.hbm [shape: f32[16,128], index: 8, kind: output, shape index: {0}]   ;;  %s1983_s9 = inlined_call_operand.hbm [shape: f32[16,128], index: 9, kind: output, shape index: {1}]   ;;  %s1984_s10 = inlined_call_operand.hbm [shape: f32[16,128], index: 10, kind: output, shape index: {2}]  }
   0x1   :  { %1993 = sst [smem:[#allocation23_spill]] %s1976_s2 }
   0x2   :  { %1994 = sst [smem:[#allocation24_spill]] %s1978_s4 }
   0x3   :  { %1995 = sst [smem:[#allocation25_spill]] %s1980_s6 }
   0x4   :  { %1996 = sst [smem:[#allocation26_spill]] %s1981_s7 }
   0x5   :  { %1997 = sst [smem:[#allocation27_spill]] %s1984_s10 }
   0x6   :  { %16 = vsyncpa [#allocation3], 0 }
   0x7   :  { %18 = vsyncpa [#allocation3 + $0x1], 0 }
   0x8   :  { %19 = vsyncpa [#allocation6], 0 }
   0x9   :  { %21 = vsyncpa [#allocation6 + $0x1], 0 }
   0xa   :  { %22 = vsyncpa [#allocation9], 0 }
   0xb   :  { %23 = vsyncpa [#allocation4], 0 }
   0xc   :  { %25 = vsyncpa [#allocation4 + $0x1], 0 }
   0xd   :  { %26 = vsyncpa [#allocation13], 0 }
   0xe   :  { %28 = vsyncpa [#allocation13 + $0x1], 0  ;;  %s1585_s13 = smov 0   ;;  %s1587_s14 = smov 0  }
   0xf   :  { %s1589_s15 = smov 0   ;;  %s1591_s16 = smov 0  }
  0x10 LB: > { %1998 = sst [smem:[#allocation21_spill]] %s1503_s13  ;;  %s1606_s17 = sadd.s32 4294967295, %s1515_s16   ;;  %s1515_s16 = sphi %s1591_s16, %s2029_s16   ;;  %s1511_s15 = sphi %s1589_s15, %s2028_s15   ;;  %s1507_s14 = sphi %s1587_s14, %s2027_s14   ;;  %s1503_s13 = sphi %s1585_s13, %s2026_s13  }
  0x11   : > { %s1985_s18 = sadd.s32 4294967294, %s1515_s16   ;;  %p54_p0 = scmp.ne.s32.totalorder %s1507_s14, %s1503_s13 }
  0x12   : > { %p1986_p1 = scmp.eq.s32.totalorder %s1606_s17, 0  ;;  %p236_p3 = scmp.eq.s32.totalorder %s1985_s18, 1 }
  0x13   : > { %p980_p5 = scmp.ge.s32.totalorder %s1515_s16, 1  ;;  %p295_p7 = scmp.lt.s32.totalorder %s1515_s16, 3 }
  0x14   : > { %p1617_p4 = por %p1986_p1, %p54_p0  ;;  %p1622_p6 = por %p236_p3, %p54_p0 }
  0x15   : > { %p1627_p8 = pnand %p980_p5, %p295_p7  ;;  %s1517_s22 = smov [#allocation7]  }
  0x16   : > { %s1999_s19 = scalar_select %p1617_p4, 1, 0 }
  0x17   : > { %s2000_s20 = scalar_select %p1622_p6, 1, 0 }
  0x18   : > { %s2002_s21 = scalar_select %p1627_p8, 1, 0 }
  0x19   : > { %2001 = sst [smem:[#allocation22_spill]] %s2000_s20  ;;  %s307_s23 = sshll.u32 %s1517_s22, 4  ;;  %s1631_s23 = int_to_ptr.vmem [resolvable:$true] %s307_s23 }
  0x1a   : > { %p1154_p9 = pneg %p1627_p8  ;;  %s1518_s25 = smov [#allocation8]  }
  0x1b   : > { %s323_s26 = sshll.u32 %s1518_s25, 4  ;;  %s1519_s27 = smov [#allocation10]   ;;  %s1642_s26 = int_to_ptr.vmem [resolvable:$true] %s323_s26 }
  0x1c   : > { %p1638_p11 = pnand %p1154_p9, %p1986_p1  ;;  %s1644_s28 = sshll.u32 %s1519_s27, 4  ;;  %s340_s28 = int_to_ptr.vmem [resolvable:$true] %s1644_s28 }
  0x1d   : > { %s2004_s2 = sld [smem:[#allocation23_spill]] }
  0x1e   : > { %p1654_p13 = pneg %p1638_p11 }
  0x23   : > { %s1233_s11 = scalar_lea.hbm %s2004_s2, 512 }
  0x24   : > { %p1234_p12 = scmp.ne.s32.totalorder %s2004_s2, %s1233_s11  ;;  %p1240_p5 = scmp.lt.u32.totalorder %s1233_s11, %s2004_s2 }
  0x26   : > { %p1236_p0 = pnand %p1654_p13, %p1234_p12 }
  0x28   : > { %p1237_p3 = pneg %p1236_p0 }
  0x2a   : > { %p1242_p7 = pnand %p1240_p5, %p1237_p3 }
  0x2c   : > { %1245 = shalt.err (!%p1242_p7)
}
  0x2d   : > { %s1246_s29 = scalar_lea.vmem %s1631_s23, 512  ;;  %p1254_p2 = scmp.lt.s32.totalorder %s1631_s23, %s1631_s23 }
  0x2e   : > { %p1247_p9 = scmp.ne.s32.totalorder %s1631_s23, %s1246_s29  ;;  %p1255_p6 = scmp.lt.s32.totalorder %s1246_s29, %s1246_s29 }
  0x30   : > { %p1249_p10 = pnand %p1247_p9, %p1654_p13  ;;  %p1256_p12 = por %p1255_p6, %p1254_p2 }
  0x32   : > { %p1250_p1 = pneg %p1249_p10 }
  0x34   : > { %p1257_p0 = pnand %p1256_p12, %p1250_p1 }
  0x36   : > { %1260 = shalt.err (!%p1257_p0)
}
  0x37   : > { %s1520_s30 = smov 128   ;;  %s1521_s11 = smov 8  }
  0x38   : > { %1157 = dma.hbm_to_vmem [thread:$0]  (!%p1638_p11), %s2004_s2, 512, %s1631_s23, [#allocation6], %s1520_s30, %s1520_s30, %s1521_s11  }
  0x39   : > { %s2006_s4 = sld [smem:[#allocation24_spill]] }
  0x3f   : > { %s1261_s29 = scalar_lea.hbm %s2006_s4, 512 }
  0x40   : > { %p1262_p1 = scmp.ne.s32.totalorder %s2006_s4, %s1261_s29  ;;  %p1268_p10 = scmp.lt.u32.totalorder %s1261_s29, %s2006_s4 }
  0x42   : > { %p1264_p2 = pnand %p1262_p1, %p1654_p13 }
  0x44   : > { %p1265_p6 = pneg %p1264_p2 }
  0x46   : > { %p1270_p3 = pnand %p1268_p10, %p1265_p6 }
  0x48   : > { %1273 = shalt.err (!%p1270_p3)
}
  0x49   : > { %s1274_s23 = scalar_lea.vmem %s1642_s26, 512  ;;  %p1282_p12 = scmp.lt.s32.totalorder %s1642_s26, %s1642_s26 }
  0x4a   : > { %p1275_p5 = scmp.ne.s32.totalorder %s1642_s26, %s1274_s23  ;;  %p1283_p0 = scmp.lt.s32.totalorder %s1274_s23, %s1274_s23 }
  0x4c   : > { %p1277_p7 = pnand %p1275_p5, %p1654_p13  ;;  %p1284_p1 = por %p1283_p0, %p1282_p12 }
  0x4e   : > { %p1278_p9 = pneg %p1277_p7 }
  0x50   : > { %p1285_p2 = pnand %p1284_p1, %p1278_p9 }
  0x52   : > { %1288 = shalt.err (!%p1285_p2)
}
  0x53   : > { %1160 = dma.hbm_to_vmem [thread:$0]  (!%p1638_p11), %s2006_s4, 512, %s1642_s26, [#allocation9], %s1520_s30, %s1520_s30, %s1521_s11  }
  0x54   : > { %s2007_s6 = sld [smem:[#allocation25_spill]] }
  0x5a   : > { %s1289_s12 = scalar_lea.hbm %s2007_s6, 2048 }
  0x5b   : > { %p1290_p6 = scmp.ne.s32.totalorder %s2007_s6, %s1289_s12  ;;  %p1296_p5 = scmp.lt.u32.totalorder %s1289_s12, %s2007_s6 }
  0x5d   : > { %p1292_p10 = pnand %p1290_p6, %p1654_p13 }
  0x5f   : > { %p1293_p3 = pneg %p1292_p10 }
  0x61   : > { %p1298_p7 = pnand %p1296_p5, %p1293_p3 }
  0x63   : > { %1301 = shalt.err (!%p1298_p7)
}
  0x64   : > { %s1302_s23 = scalar_lea.vmem %s340_s28, 2048  ;;  %p1310_p1 = scmp.lt.s32.totalorder %s340_s28, %s340_s28 }
  0x65   : > { %p1303_p9 = scmp.ne.s32.totalorder %s340_s28, %s1302_s23  ;;  %p1311_p2 = scmp.lt.s32.totalorder %s1302_s23, %s1302_s23 }
  0x67   : > { %p1305_p12 = pnand %p1303_p9, %p1654_p13  ;;  %p1312_p4 = por %p1311_p2, %p1310_p1 }
  0x69   : > { %p1306_p0 = pneg %p1305_p12 }
  0x6b   : > { %p1313_p8 = pnand %p1312_p4, %p1306_p0 }
  0x6d   : > { %1316 = shalt.err (!%p1313_p8)
}
  0x6e   : > { %1163 = dma.hbm_to_vmem [thread:$0]  (!%p1638_p11), %s2007_s6, 2048, %s340_s28, [#allocation9], %s1520_s30, %s1520_s30, %s1521_s11  }
  0x6f   : > { %s1727_s18 = sadd.s32 1, %s1515_s16   ;;  %s41_s10 = sadd.s32 1, %s1511_s15 }
  0x70   : > { %s38_s24 = ssub.s32 %s1515_s16, %s1727_s18  ;;  %p48_p8 = scmp.ne.s32.totalorder %s1511_s15, %s1507_s14 }
  0x71   : > { %p39_p4 = scmp.eq.s32.totalorder %s38_s24, 0  ;;  %p49_p13 = scmp.eq.s32.totalorder %s1515_s16, 0 }
  0x72   : > { %p1184_p6 = scmp.lt.s32.totalorder %s1515_s16, 2  ;;  %p2008_p3 = scmp.eq.s32.totalorder %s1606_s17, 1 }
  0x73   : > { %s1737_s13 = scalar_select %p39_p4, %s1511_s15, %s41_s10  }
  0x74   : > { %p50_p10 = por %p49_p13, %p48_p8  ;;  %p1741_p5 = por %p2008_p3, %p48_p8 }
  0x75   : > { %s356_s12 = sand.u32 1, %s1511_s15   ;;  %s986_s22 = sshll.u32 %s1515_s16, 7 }
  0x76   : > { %s2009_s20 = scalar_select %p1741_p5, 1, 0 }
  0x77   : > { %s1747_s28 = sshll.u32 %s356_s12, 3  ;;  %s1752_s25 = scalar_lea.hbm %s1974_s0, %s986_s22 }
  0x78   : > { %s360_s27 = scalar_lea.vmem [#allocation2], %s1747_s28  ;;  %p1755_p11 = pnand %p1184_p6, %p50_p10 }
  0x79   : > { %s367_s29 = sshll.u32 %s360_s27, 4  ;;  %s1764_s24 = scalar_lea.hbm %s1975_s1, %s986_s22  ;;  %s1759_s29 = int_to_ptr.vmem [resolvable:$true] %s367_s29 }
  0x7a   : > { %s357_s10 = scalar_lea.sflag [#allocation3], %s356_s12  ;;  %s1317_s30 = scalar_lea.hbm %s1752_s25, 128 }
  0x7b   : > { %p1318_p7 = scmp.ne.s32.totalorder %s1752_s25, %s1317_s30  ;;  %p1319_p9 = pneg %p1755_p11 }
  0x7c   : > { %s1322_s2 = scalar_lea.hbm %s1974_s0, 256  ;;  %p1323_p1 = scmp.lt.u32.totalorder %s1752_s25, %s1974_s0 }
  0x7d   : > { %p1320_p12 = pnand %p1319_p9, %p1318_p7  ;;  %p1324_p2 = scmp.lt.u32.totalorder %s1322_s2, %s1317_s30 }
  0x7e   : > { %p1326_p8 = scmp.lt.u32.totalorder %s1317_s30, %s1752_s25 }
  0x7f   : > { %p1321_p0 = pneg %p1320_p12  ;;  %p1325_p4 = por %p1324_p2, %p1323_p1 }
  0x81   : > { %p1327_p13 = por %p1326_p8, %p1325_p4 }
  0x83   : > { %p1328_p6 = pnand %p1327_p13, %p1321_p0 }
  0x85   : > { %1331 = shalt.err (!%p1328_p6)
}
  0x86   : > { %s1332_s12 = scalar_lea.vmem %s1759_s29, 128  ;;  %s1522_s22 = smov [#allocation2]  }
  0x87   : > { %p1333_p10 = scmp.ne.s32.totalorder %s1759_s29, %s1332_s12  ;;  %s1337_s26 = sshll.u32 %s1522_s22, 4  ;;  %s1338_s26 = int_to_ptr.vmem [resolvable:$false] %s1337_s26 }
  0x88   : > { %s1339_s4 = scalar_lea.vmem %s1338_s26, 256  ;;  %p1340_p12 = scmp.lt.s32.totalorder %s1759_s29, %s1338_s26 }
  0x89   : > { %p1335_p3 = pnand %p1333_p10, %p1319_p9  ;;  %p1341_p1 = scmp.lt.s32.totalorder %s1339_s4, %s1332_s12 }
  0x8b   : > { %p1336_p7 = pneg %p1335_p3  ;;  %p1342_p2 = por %p1341_p1, %p1340_p12 }
  0x8d   : > { %p1343_p4 = pnand %p1342_p2, %p1336_p7 }
  0x8f   : > { %1346 = shalt.err (!%p1343_p4)
}
  0x90   : > { %1167 = dma.hbm_to_vmem [thread:$0]  (!%p1755_p11), %s1752_s25, 128, %s1759_s29, %s357_s10  }
  0x91   : > { %s374_s2 = sand.u32 1, %s1515_s16   ;;  %s378_s6 = scalar_lea.vmem [#allocation5], %s1747_s28 }
  0x92   : > { %s385_s7 = sshll.u32 %s378_s6, 4  ;;  %s375_s30 = scalar_lea.sflag [#allocation6], %s374_s2  ;;  %s386_s7 = int_to_ptr.vmem [resolvable:$true] %s385_s7 }
  0x93   : > { %s1347_s11 = scalar_lea.hbm %s1764_s24, 128  ;;  %s1352_s22 = scalar_lea.hbm %s1975_s1, 256 }
  0x94   : > { %p1348_p0 = scmp.ne.s32.totalorder %s1764_s24, %s1347_s11  ;;  %p1353_p6 = scmp.lt.u32.totalorder %s1764_s24, %s1975_s1 }
  0x95   : > { %p1354_p10 = scmp.lt.u32.totalorder %s1352_s22, %s1347_s11  ;;  %p1356_p7 = scmp.lt.u32.totalorder %s1347_s11, %s1764_s24 }
  0x96   : > { %p1350_p8 = pnand %p1348_p0, %p1319_p9 }
  0x97   : > { %p1355_p3 = por %p1354_p10, %p1353_p6 }
  0x98   : > { %p1351_p13 = pneg %p1350_p8 }
  0x99   : > { %p1357_p12 = por %p1356_p7, %p1355_p3 }
  0x9b   : > { %p1358_p1 = pnand %p1357_p12, %p1351_p13 }
  0x9d   : > { %1361 = shalt.err (!%p1358_p1)
}
  0x9e   : > { %s1362_s28 = scalar_lea.vmem %s386_s7, 128  ;;  %s1523_s25 = smov [#allocation5]  }
  0x9f   : > { %p1363_p2 = scmp.ne.s32.totalorder %s386_s7, %s1362_s28  ;;  %s1367_s29 = sshll.u32 %s1523_s25, 4  ;;  %s1368_s29 = int_to_ptr.vmem [resolvable:$false] %s1367_s29 }
  0xa0   : > { %s1369_s10 = scalar_lea.vmem %s1368_s29, 256  ;;  %p1370_p8 = scmp.lt.s32.totalorder %s386_s7, %s1368_s29 }
  0xa1   : > { %p1365_p4 = pnand %p1363_p2, %p1319_p9  ;;  %p1371_p5 = scmp.lt.s32.totalorder %s1369_s10, %s1362_s28 }
  0xa3   : > { %p1366_p0 = pneg %p1365_p4  ;;  %p1372_p6 = por %p1371_p5, %p1370_p8 }
  0xa5   : > { %p1373_p10 = pnand %p1372_p6, %p1366_p0 }
  0xa7   : > { %1376 = shalt.err (!%p1373_p10)
}
  0xa8   : > { %1170 = dma.hbm_to_vmem [thread:$0]  (!%p1755_p11), %s1764_s24, 128, %s386_s7, %s375_s30  }
  0xa9   : > { %p2011_p13 = scmp.ne.s32.totalorder %s2002_s21, 0 }
  0xaa   : > { %s1815_s2 = sand.u32 (!%p2011_p13), 1, %s1507_s14   ;;  %p2012_p5 = scmp.ne.s32.totalorder (!%p2011_p13), %s1999_s19, 0 }
  0xab   : > { %394 = sbr.rel (%p2011_p13) target bundleno = 669 (0x29d), region = 52  ;;  %s1818_s6 = sshll.u32 (!%p2011_p13), %s1815_s2, 3 }
  0xac   : > { %s397_s11 = scalar_lea.sflag (!%p2011_p13), [#allocation3], %s1815_s2  ;;  %s400_s27 = scalar_lea.vmem (!%p2011_p13), [#allocation2], %s1818_s6 }
  0xb2   : > { %1478 = dma.done.wait (%p2012_p5), %s397_s11, 128  }
  0xb3   : > { %1480 = vsyncadd (%p2012_p5), %s397_s11, 4294967168  ;;  %s405_s21 = sand.u32 1, %s1606_s17   ;;  %s409_s24 = scalar_lea.vmem [#allocation5], %s1818_s6 }
  0xb4   : > { %s406_s23 = scalar_lea.sflag [#allocation6], %s405_s21 }
  0xb5   : > { %1482 = dma.done.wait (%p2012_p5), %s406_s23, 128  }
  0xb6   : > { %1484 = vsyncadd (%p2012_p5), %s406_s23, 4294967168  ;;  %p2013_p11 = scmp.eq.s32.totalorder %s1606_s17, 0 }
  0xb8   : > { %1486 = dma.done.wait (%p2013_p11), [#allocation6], 512   ;;  %p2014_p9 = pmov %p2013_p11 }
  0xba   : > { %1488 = vsyncadd (%p2014_p9), [#allocation6], 4294966784  ;;  %p2015_p3 = pmov %p2014_p9 }
  0xbc   : > { %1490 = dma.done.wait (%p2015_p3), [#allocation9], 2560   ;;  %p2016_p7 = pmov %p2015_p3 }
  0xbd   : > { %v1524_v0 = vmov 0.0|0.0   ;;  %vm1525_vm0 = vmmov 0   ;;  %v1526_v1 = vmov 0.0   ;;  %v475_v2 = vld [vmem:[#allocation7] sm:$0xff]  ;;  %v476_v3 = vld [vmem:[#allocation7 + $0x8] sm:$0xff]  ;;  %v477_v4 = vld [vmem:[#allocation7 + $0x10] sm:$0xff] }
  0xbe   : > { %1492 = vsyncadd (%p2016_p7), [#allocation9], 4294964736  ;;  %1096 = vmatprep.subr.bf16.mxu1 %v1524_v0  ;;  %1047 = vmatprep.mubr.msk.f32.mxu1 %vm1525_vm0, %v1526_v1  ;;  %v1097_v5 = vpack.c.bf16 %v476_v3, %v475_v2  ;;  %v478_v6 = vld [vmem:[#allocation7 + $0x18] sm:$0xff]  ;;  %v560_v8 = vld [vmem:[#allocation8] sm:$0xff]  ;;  %vm486_vm1 = vcmask 261120   ;;  %s458_s30 = scalar_lea.vmem [#allocation11], %s1818_s6 }
  0xbf   : > { %1108 = vmatprep.subr.bf16.mxu0 %v1524_v0  ;;  %1093 = vmatprep.mubr.msk.f32.mxu0 %vm1525_vm0, %v1526_v1  ;;  %v1100_v7 = vpack.c.bf16 %v478_v6, %v477_v4  ;;  %v561_v9 = vld [vmem:[#allocation8 + $0x8] sm:$0xff]  ;;  %v562_v12 = vld [vmem:[#allocation8 + $0x10] sm:$0xff]  ;;  %v563_v13 = vld [vmem:[#allocation8 + $0x18] sm:$0xff]  ;;  %s465_s26 = scalar_lea.vmem [#allocation12], %s1818_s6  ;;  %s1870_s4 = sshll.u32 %s1606_s17, 7 }
  0xc0   : > { %1098 = vmatpush3.bf16.msra.mxu1 %v1097_v5  ;;  %v473_v10 = vld [vmem:[%s400_s27] sm:$0xff]  ;;  %v1103_v11 = vpack.c.bf16 %v561_v9, %v560_v8  ;;  %v1106_v14 = vpack.c.bf16 %v563_v13, %v562_v12  ;;  %v474_v15 = vld [vmem:[%s409_s24] sm:$0xff]  ;;  %s784_s28 = sshll.u32 %s465_s26, 4  ;;  %s1876_s10 = scalar_lea.hbm %s1983_s9, %s1870_s4  ;;  %s785_s28 = int_to_ptr.vmem [resolvable:$true] %s784_s28 }
  0xc1   : > { %1099 = vmatprep.subr.bf16.mxu1 %v1524_v0  ;;  %v651_v16 = vld [vmem:[#allocation10] sm:$0xff]  ;;  %v652_v17 = vld [vmem:[#allocation10 + $0x8] sm:$0xff]  ;;  %v653_v19 = vld [vmem:[#allocation10 + $0x10] sm:$0xff]  ;;  %s1880_s11 = scalar_lea.sflag [#allocation13], %s405_s21  ;;  %s1377_s27 = scalar_lea.vmem %s785_s28, 128 }
  0xc2   : > { %v1109_v18 = vpack.c.bf16 %v652_v17, %v651_v16  ;;  %v654_v20 = vld [vmem:[#allocation10 + $0x18] sm:$0xff]  ;;  %v655_v22 = vld [vmem:[#allocation10 + $0x20] sm:$0xff]  ;;  %v656_v23 = vld [vmem:[#allocation10 + $0x28] sm:$0xff]  ;;  %p1378_p12 = scmp.ne.s32.totalorder %s785_s28, %s1377_s27  ;;  %p2017_p1 = scmp.ne.s32.totalorder %s2009_s20, 0 }
  0xc3   : > { %v1112_v21 = vpack.c.bf16 %v654_v20, %v653_v19  ;;  %v1115_v24 = vpack.c.bf16 %v656_v23, %v655_v22  ;;  %v657_v25 = vld [vmem:[#allocation10 + $0x30] sm:$0xff]  ;;  %v658_v26 = vld [vmem:[#allocation10 + $0x38] sm:$0xff]  ;;  %v659_v28 = vld [vmem:[#allocation10 + $0x40] sm:$0xff]  ;;  %s1527_s23 = smov [#allocation12]  }
  0xc4   : > { %1101 = vmatpush3.bf16.msra.mxu1 %v1100_v7  ;;  %1110 = vmatpush3.bf16.msra.mxu0 %v1109_v18  ;;  %v1118_v27 = vpack.c.bf16 %v658_v26, %v657_v25  ;;  %v660_v29 = vld [vmem:[#allocation10 + $0x48] sm:$0xff]  ;;  %v661_v31 = vld [vmem:[#allocation10 + $0x50] sm:$0xff]  ;;  %v662_v32 = vld [vmem:[#allocation10 + $0x58] sm:$0xff]  ;;  %p1379_p2 = pnand %p1378_p12, %p2017_p1  ;;  %s1381_s24 = sshll.u32 %s1527_s23, 4  ;;  %s1382_s24 = int_to_ptr.vmem [resolvable:$false] %s1381_s24 }
  0xc5   : > { %1102 = vmatprep.subr.bf16.mxu1 %v1524_v0  ;;  %1111 = vmatprep.subr.bf16.mxu0 %v1524_v0  ;;  %v1121_v30 = vpack.c.bf16 %v660_v29, %v659_v28  ;;  %v1124_v33 = vpack.c.bf16 %v662_v32, %v661_v31  ;;  %v663_v34 = vld [vmem:[#allocation10 + $0x60] sm:$0xff]  ;;  %v664_v35 = vld [vmem:[#allocation10 + $0x68] sm:$0xff]  ;;  %v665_v37 = vld [vmem:[#allocation10 + $0x70] sm:$0xff]  ;;  %s1383_s19 = scalar_lea.vmem %s1382_s24, 256  ;;  %p1384_p0 = scmp.lt.s32.totalorder %s785_s28, %s1382_s24 }
  0xc6   : > { %v1127_v36 = vpack.c.bf16 %v664_v35, %v663_v34  ;;  %v666_v38 = vld [vmem:[#allocation10 + $0x78] sm:$0xff]  ;;  %v998_v40 = vld [vmem:[%s1977_s3] ss:$0 sm:$0xff]  ;;  %p1380_p4 = pneg %p1379_p2  ;;  %p1385_p8 = scmp.lt.s32.totalorder %s1383_s19, %s1377_s27 }
  0xc7   : > { %1048 = vmatmul.mubr.msk.f32.vlgmr.msra.gmra.mrb[0].mxu1 %vm486_vm1, %v473_v10  ;;  %v1130_v39 = vpack.c.bf16 %v666_v38, %v665_v37  ;;  %v1000_v45 = vld [vmem:[%s1979_s5] ss:$0 sm:$0xff] }
  0xc8   : > { %1104 = vmatpush3.bf16.msra.mxu1 %v1103_v11  ;;  %1058 = vmatprep.mubr.msk.f32.mxu1 %vm1525_vm0, %v1526_v1  ;;  %p1386_p6 = por %p1385_p8, %p1384_p0 }
  0xc9   : > { %1105 = vmatprep.subr.bf16.mxu1 %v1524_v0  ;;  %1113 = vmatpush3.bf16.msra.mxu0 %v1112_v21 }
  0xca   : > { %1114 = vmatprep.subr.bf16.mxu0 %v1524_v0  ;;  %p1387_p10 = pnand %p1386_p6, %p1380_p4 }
  0xcc   : > { %1107 = vmatpush3.bf16.msra.mxu1 %v1106_v14 }
  0xcd   : > { %1116 = vmatpush3.bf16.msra.mxu0 %v1115_v24 }
  0xce   : > { %1117 = vmatprep.subr.bf16.mxu0 %v1524_v0 }
  0xcf   : > { %1059 = vmatmul.mubr.msk.f32.vlgmr.msra.gmra.mrb[2].mxu1 %vm486_vm1, %v474_v15 }
  0xd1   : > { %1119 = vmatpush3.bf16.msra.mxu0 %v1118_v27 }
  0xd2   : > { %1120 = vmatprep.subr.bf16.mxu0 %v1524_v0 }
  0xd5   : > { %1122 = vmatpush3.bf16.msra.mxu0 %v1121_v30 }
  0xd6   : > { %1123 = vmatprep.subr.bf16.mxu0 %v1524_v0 }
  0xd9   : > { %1125 = vmatpush3.bf16.msra.mxu0 %v1124_v33 }
  0xda   : > { %1126 = vmatprep.subr.bf16.mxu0 %v1524_v0 }
  0xdd   : > { %1128 = vmatpush3.bf16.msra.mxu0 %v1127_v36 }
  0xde   : > { %1129 = vmatprep.subr.bf16.mxu0 %v1524_v0 }
  0xe1   : > { %1131 = vmatpush3.bf16.msra.mxu0 %v1130_v39 }
 0x19a   : > { %v556_v41 = vpop.f32.mrb[0].mxu1 }
 0x19b   : > { %v557_v42 = vadd.f32 %v998_v40, %v556_v41  ;;  %v1049_v43 = vpop.f32.mrb[1].mxu1 }
 0x19d   : > { %v1002_v44 = vmul.f32 -1.442695, %v557_v42  ;;  %744 = vst [vmem:[%s458_s30] sm:$0xff] %v557_v42 }
 0x19f   : > { %1229 = vpow2.f32 %v1002_v44 }
 0x1a2   : > { %v640_v46 = vpop.f32.mrb[2].mxu1 }
 0x1a3   : > { %v641_v47 = vadd.f32 %v1000_v45, %v640_v46  ;;  %v1060_v48 = vpop.f32.mrb[3].mxu1 }
 0x1a5   : > { %745 = vst [vmem:[%s465_s26] sm:$0xff] %v641_v47 }
 0x1a9   : > { %v1230_v49 = vpop.eup %1229 }
 0x1aa   : > { %v647_v50 = vadd.f32 1.0, %v1230_v49 }
 0x1ac   : > { %1231 = vrcp.f32 %v647_v50 }
 0x1b6   : > { %v1232_v51 = vpop.eup %1231 }
 0x1b7   : > { %v650_v52 = vmul.f32 %v1232_v51, %v641_v47 }
 0x1b9   : > { %1094 = vmatmul.mubr.f32.vlgmr.msra.gmra.mrb[0].mxu0 %v650_v52 }
 0x1ba   : > { %1390 = shalt.err (!%p1387_p10)
}
 0x1bb   : > { %s1391_s17 = scalar_lea.hbm %s1876_s10, 128  ;;  %s1395_s12 = scalar_lea.hbm %s1983_s9, 256 }
 0x1bc   : > { %p1392_p13 = scmp.ne.s32.totalorder %s1876_s10, %s1391_s17  ;;  %p1396_p9 = scmp.lt.u32.totalorder %s1876_s10, %s1983_s9 }
 0x1bd   : > { %p1397_p3 = scmp.lt.u32.totalorder %s1395_s12, %s1391_s17  ;;  %p1399_p12 = scmp.lt.u32.totalorder %s1391_s17, %s1876_s10 }
 0x1be   : > { %p1393_p5 = pnand %p1392_p13, %p2017_p1 }
 0x1bf   : > { %p1398_p7 = por %p1397_p3, %p1396_p9 }
 0x1c0   : > { %p1394_p11 = pneg %p1393_p5 }
 0x1c1   : > { %p1400_p2 = por %p1399_p12, %p1398_p7 }
 0x1c3   : > { %p1401_p4 = pnand %p1400_p2, %p1394_p11 }
 0x1c5   : > { %1404 = shalt.err (!%p1401_p4)
}
 0x1c6   : > { %1149 = dma.vmem_to_hbm [thread:$0]  (%p2017_p1), %s785_s28, 128, %s1876_s10, %s1880_s11  }
 0x1c7   : > { %s1904_s27 = scalar_lea.hbm %s1982_s8, %s1870_s4  ;;  %s771_s23 = sshll.u32 %s458_s30, 4  ;;  %s772_s23 = int_to_ptr.vmem [resolvable:$true] %s771_s23 }
 0x1c8   : > { %s748_s24 = scalar_lea.sflag [#allocation4], %s1815_s2  ;;  %s1405_s19 = scalar_lea.vmem %s772_s23, 128 }
 0x1c9   : > { %p1406_p0 = scmp.ne.s32.totalorder %s772_s23, %s1405_s19  ;;  %s1528_s17 = smov [#allocation11]  }
 0x1ca   : > { %s1409_s21 = sshll.u32 %s1528_s17, 4  ;;  %s1410_s21 = int_to_ptr.vmem [resolvable:$false] %s1409_s21 }
 0x1cb   : > { %p1407_p8 = pnand %p1406_p0, %p2017_p1  ;;  %s1411_s7 = scalar_lea.vmem %s1410_s21, 256 }
 0x1cc   : > { %p1412_p10 = scmp.lt.s32.totalorder %s772_s23, %s1410_s21  ;;  %p1413_p13 = scmp.lt.s32.totalorder %s1411_s7, %s1405_s19 }
 0x1cd   : > { %p1408_p6 = pneg %p1407_p8 }
 0x1ce   : > { %p1414_p5 = por %p1413_p13, %p1412_p10 }
 0x1d0   : > { %p1415_p11 = pnand %p1414_p5, %p1408_p6 }
 0x1d2   : > { %1418 = shalt.err (!%p1415_p11)
}
 0x1d3   : > { %s1419_s2 = scalar_lea.hbm %s1904_s27, 128  ;;  %s1423_s10 = scalar_lea.hbm %s1982_s8, 256 }
 0x1d4   : > { %p1420_p9 = scmp.ne.s32.totalorder %s1904_s27, %s1419_s2  ;;  %p1424_p12 = scmp.lt.u32.totalorder %s1904_s27, %s1982_s8 }
 0x1d5   : > { %p1425_p2 = scmp.lt.u32.totalorder %s1423_s10, %s1419_s2  ;;  %p1427_p0 = scmp.lt.u32.totalorder %s1419_s2, %s1904_s27 }
 0x1d6   : > { %p1421_p3 = pnand %p1420_p9, %p2017_p1 }
 0x1d7   : > { %p1426_p4 = por %p1425_p2, %p1424_p12 }
 0x1d8   : > { %p1422_p7 = pneg %p1421_p3 }
 0x1d9   : > { %p1428_p8 = por %p1427_p0, %p1426_p4 }
 0x1db   : > { %p1429_p6 = pnand %p1428_p8, %p1422_p7 }
 0x1dd   : > { %1432 = shalt.err (!%p1429_p6)
}
 0x1de   : > { %1148 = dma.vmem_to_hbm [thread:$0]  (%p2017_p1), %s772_s23, 128, %s1904_s27, %s748_s24  }
 0x1df   : > { %s2018_s29 = sld [smem:[#allocation26_spill]]  ;;  %s472_s19 = scalar_lea.vmem [#allocation14], %s1818_s6 }
 0x1e0   : > { %s797_s17 = sshll.u32 %s472_s19, 4  ;;  %s2019_s2 = sld [smem:[#allocation27_spill]]  ;;  %s798_s17 = int_to_ptr.vmem [resolvable:$true] %s797_s17 }
 0x1e1   : > { %s1433_s28 = scalar_lea.vmem %s798_s17, 128  ;;  %s1529_s27 = smov [#allocation14]  }
 0x1e2   : > { %p1434_p10 = scmp.ne.s32.totalorder %s798_s17, %s1433_s28  ;;  %s1437_s23 = sshll.u32 %s1529_s27, 4  ;;  %s1438_s23 = int_to_ptr.vmem [resolvable:$false] %s1437_s23 }
 0x1e3   : > { %s1439_s6 = scalar_lea.vmem %s1438_s23, 256  ;;  %p1440_p11 = scmp.lt.s32.totalorder %s798_s17, %s1438_s23 }
 0x1e4   : > { %p1435_p13 = pnand %p1434_p10, %p2017_p1  ;;  %p1441_p9 = scmp.lt.s32.totalorder %s1439_s6, %s1433_s28 }
 0x1e5   : > { %v1003_v53 = vld [vmem:[%s2018_s29] ss:$0 sm:$0xff] }
 0x1e6   : > { %s1934_s30 = scalar_lea.hbm %s2019_s2, %s1870_s4  ;;  %p1436_p5 = pneg %p1435_p13 }
 0x1e7   : > { %p1442_p3 = por %p1441_p9, %p1440_p11 }
 0x1e9   : > { %p1443_p7 = pnand %p1442_p3, %p1436_p5 }
 0x28c   : > { %v740_v54 = vpop.f32.mrb[0].mxu0 }
 0x28d   : > { %v741_v55 = vadd.f32 %v1003_v53, %v740_v54  ;;  %v1095_v56 = vpop.f32.mrb[1].mxu0 }
 0x28f   : > { %746 = vst [vmem:[%s472_s19] sm:$0xff] %v741_v55 }
 0x290   : > { %1446 = shalt.err (!%p1443_p7)
}
 0x291   : > { %s1447_s4 = scalar_lea.hbm %s1934_s30, 128  ;;  %s1451_s12 = scalar_lea.hbm %s2019_s2, 256 }
 0x292   : > { %p1448_p12 = scmp.ne.s32.totalorder %s1934_s30, %s1447_s4  ;;  %p1452_p0 = scmp.lt.u32.totalorder %s1934_s30, %s2019_s2 }
 0x293   : > { %p1453_p8 = scmp.lt.u32.totalorder %s1451_s12, %s1447_s4  ;;  %p1455_p10 = scmp.lt.u32.totalorder %s1447_s4, %s1934_s30 }
 0x294   : > { %p1449_p2 = pnand %p1448_p12, %p2017_p1 }
 0x295   : > { %p1454_p6 = por %p1453_p8, %p1452_p0 }
 0x296   : > { %p1450_p4 = pneg %p1449_p2 }
 0x297   : > { %p1456_p13 = por %p1455_p10, %p1454_p6 }
 0x299   : > { %p1457_p5 = pnand %p1456_p13, %p1450_p4 }
 0x29b   : > { %1460 = shalt.err (!%p1457_p5)
}
 0x29c   : > { %1150 = dma.vmem_to_hbm [thread:$0]  (%p2017_p1), %s798_s17, 128, %s1934_s30, %s1880_s11  }
 0x29d PF: > { %s2020_s25 = sld [smem:[#allocation21_spill]]  ;;  %s2021_s29 = sld [smem:[#allocation22_spill]] }
 0x29e   : > { %p2023_p9 = scmp.ge.s32.totalorder %s1515_s16, 2 }
 0x2a3   : > { %s809_s19 = sand.u32 1, %s2020_s25   ;;  %p2022_p11 = scmp.ne.s32.totalorder %s2021_s29, 0 }
 0x2a4   : > { %s810_s21 = scalar_lea.sflag [#allocation4], %s809_s19 }
 0x2a5   : > { %p1172_p3 = pnand %p2023_p9, %p2022_p11 }
 0x2a7   : > { %1494 = dma.done.wait (!%p1172_p3), %s810_s21, 128  }
 0x2a8   : > { %1496 = vsyncadd (!%p1172_p3), %s810_s21, 4294967168  ;;  %s2024_s7 = sadd.s32 4294967294, %s1515_s16  }
 0x2a9   : > { %s818_s28 = sand.u32 1, %s2024_s7  }
 0x2aa   : > { %s819_s27 = scalar_lea.sflag [#allocation13], %s818_s28 }
 0x2ab   : > { %1498 = dma.done.wait (!%p1172_p3), %s819_s27, 256  }
 0x2ac   : > { %1500 = vsyncadd (!%p1172_p3), %s819_s27, 4294967040  ;;  %s2025_s20 = smov %s1737_s13  ;;  %p31_p1 = scmp.ge.s32.totalorder %s1727_s18, 4  }
 0x2ad   : > { %s2026_s13 = smov %s1507_s14  ;;  %s2027_s14 = smov %s1511_s15 }
 0x2ae   : > { %s2028_s15 = smov %s2025_s20  ;;  %s2029_s16 = smov %s1727_s18 }
 0x2af   :  { %33 = sbr.rel (!%p31_p1) target bundleno = 16 (0x10), region = 154 }
 0x2b6   :  { %833 = vsyncpa [#allocation3], 1 }
 0x2b7   :  { %835 = vsyncpa [#allocation3 + $0x1], 1 }
 0x2b8   :  { %836 = vsyncpa [#allocation6], 1 }
 0x2b9   :  { %838 = vsyncpa [#allocation6 + $0x1], 1 }
 0x2ba   :  { %839 = vsyncpa [#allocation9], 1 }
 0x2bb   :  { %840 = vsyncpa [#allocation4], 1 }
 0x2bc   :  { %842 = vsyncpa [#allocation4 + $0x1], 1 }
 0x2bd   :  { %843 = vsyncpa [#allocation13], 1 }
 0x2be   :  { %845 = vsyncpa [#allocation13 + $0x1], 1 }

// kernel: tpu_custom_call.1
= control target key start
LH: loop header
LB: loop body
LE: loop exit
PB: predicated region body
PF: predicated region fallthrough
CT: control target
= control target key end

     0   :  { %s1974_s0 = inlined_call_operand.hbm [shape: f32[16,32], index: 0, kind: input, shape index: {}]   ;;  %s1975_s1 = inlined_call_operand.hbm [shape: f32[16,32], index: 1, kind: input, shape index: {}]   ;;  %s1976_s2 = inlined_call_operand.hbm [shape: f32[32,128], index: 2, kind: input, shape index: {}]   ;;  %s1977_s3 = inlined_call_operand.vmem [shape: f32[1,128], index: 3, kind: input, shape index: {}]   ;;  %s1978_s4 = inlined_call_operand.hbm [shape: f32[32,128], index: 4, kind: input, shape index: {}]   ;;  %s1979_s5 = inlined_call_operand.vmem [shape: f32[1,128], index: 5, kind: input, shape index: {}]   ;;  %s1980_s6 = inlined_call_operand.hbm [shape: f32[128,128], index: 6, kind: input, shape index: {}]   ;;  %s1981_s7 = inlined_call_operand.vmem [shape: f32[1,128], index: 7, kind: input, shape index: {}]   ;;  %s1982_s8 = inlined_call_operand.hbm [shape: f32[16,128], index: 8, kind: output, shape index: {0}]   ;;  %s1983_s9 = inlined_call_operand.hbm [shape: f32[16,128], index: 9, kind: output, shape index: {1}]   ;;  %s1984_s10 = inlined_call_operand.hbm [shape: f32[16,128], index: 10, kind: output, shape index: {2}]  }
   0x1   :  { %1993 = sst [smem:[#allocation23_spill]] %s1976_s2 }
   0x2   :  { %1994 = sst [smem:[#allocation24_spill]] %s1978_s4 }
   0x3   :  { %1995 = sst [smem:[#allocation25_spill]] %s1980_s6 }
   0x4   :  { %1996 = sst [smem:[#allocation26_spill]] %s1981_s7 }
   0x5   :  { %1997 = sst [smem:[#allocation27_spill]] %s1984_s10 }
   0x6   :  { %16 = vsyncpa [#allocation3], 0 }
   0x7   :  { %18 = vsyncpa [#allocation3 + $0x1], 0 }
   0x8   :  { %19 = vsyncpa [#allocation6], 0 }
   0x9   :  { %21 = vsyncpa [#allocation6 + $0x1], 0 }
   0xa   :  { %22 = vsyncpa [#allocation9], 0 }
   0xb   :  { %23 = vsyncpa [#allocation4], 0 }
   0xc   :  { %25 = vsyncpa [#allocation4 + $0x1], 0 }
   0xd   :  { %26 = vsyncpa [#allocation13], 0 }
   0xe   :  { %28 = vsyncpa [#allocation13 + $0x1], 0  ;;  %s1585_s13 = smov 0   ;;  %s1587_s14 = smov 0  }
   0xf   :  { %s1589_s15 = smov 0   ;;  %s1591_s16 = smov 0  }
  0x10 LB: > { %1998 = sst [smem:[#allocation21_spill]] %s1503_s13  ;;  %s1606_s17 = sadd.s32 4294967295, %s1515_s16   ;;  %s1515_s16 = sphi %s1591_s16, %s2029_s16   ;;  %s1511_s15 = sphi %s1589_s15, %s2028_s15   ;;  %s1507_s14 = sphi %s1587_s14, %s2027_s14   ;;  %s1503_s13 = sphi %s1585_s13, %s2026_s13  }
  0x11   : > { %s1985_s18 = sadd.s32 4294967294, %s1515_s16   ;;  %p54_p0 = scmp.ne.s32.totalorder %s1507_s14, %s1503_s13 }
  0x12   : > { %p1986_p1 = scmp.eq.s32.totalorder %s1606_s17, 0  ;;  %p236_p3 = scmp.eq.s32.totalorder %s1985_s18, 1 }
  0x13   : > { %p980_p5 = scmp.ge.s32.totalorder %s1515_s16, 1  ;;  %p295_p7 = scmp.lt.s32.totalorder %s1515_s16, 3 }
  0x14   : > { %p1617_p4 = por %p1986_p1, %p54_p0  ;;  %p1622_p6 = por %p236_p3, %p54_p0 }
  0x15   : > { %p1627_p8 = pnand %p980_p5, %p295_p7  ;;  %s1517_s22 = smov [#allocation7]  }
  0x16   : > { %s1999_s19 = scalar_select %p1617_p4, 1, 0 }
  0x17   : > { %s2000_s20 = scalar_select %p1622_p6, 1, 0 }
  0x18   : > { %s2002_s21 = scalar_select %p1627_p8, 1, 0 }
  0x19   : > { %2001 = sst [smem:[#allocation22_spill]] %s2000_s20  ;;  %s307_s23 = sshll.u32 %s1517_s22, 4  ;;  %s1631_s23 = int_to_ptr.vmem [resolvable:$true] %s307_s23 }
  0x1a   : > { %p1154_p9 = pneg %p1627_p8  ;;  %s1518_s25 = smov [#allocation8]  }
  0x1b   : > { %s323_s26 = sshll.u32 %s1518_s25, 4  ;;  %s1519_s27 = smov [#allocation10]   ;;  %s1642_s26 = int_to_ptr.vmem [resolvable:$true] %s323_s26 }
  0x1c   : > { %p1638_p11 = pnand %p1154_p9, %p1986_p1  ;;  %s1644_s28 = sshll.u32 %s1519_s27, 4  ;;  %s340_s28 = int_to_ptr.vmem [resolvable:$true] %s1644_s28 }
  0x1d   : > { %s2004_s2 = sld [smem:[#allocation23_spill]] }
  0x1e   : > { %p1654_p13 = pneg %p1638_p11 }
  0x23   : > { %s1233_s11 = scalar_lea.hbm %s2004_s2, 512 }
  0x24   : > { %p1234_p12 = scmp.ne.s32.totalorder %s2004_s2, %s1233_s11  ;;  %p1240_p5 = scmp.lt.u32.totalorder %s1233_s11, %s2004_s2 }
  0x26   : > { %p1236_p0 = pnand %p1654_p13, %p1234_p12 }
  0x28   : > { %p1237_p3 = pneg %p1236_p0 }
  0x2a   : > { %p1242_p7 = pnand %p1240_p5, %p1237_p3 }
  0x2c   : > { %1245 = shalt.err (!%p1242_p7)
}
  0x2d   : > { %s1246_s29 = scalar_lea.vmem %s1631_s23, 512  ;;  %p1254_p2 = scmp.lt.s32.totalorder %s1631_s23, %s1631_s23 }
  0x2e   : > { %p1247_p9 = scmp.ne.s32.totalorder %s1631_s23, %s1246_s29  ;;  %p1255_p6 = scmp.lt.s32.totalorder %s1246_s29, %s1246_s29 }
  0x30   : > { %p1249_p10 = pnand %p1247_p9, %p1654_p13  ;;  %p1256_p12 = por %p1255_p6, %p1254_p2 }
  0x32   : > { %p1250_p1 = pneg %p1249_p10 }
  0x34   : > { %p1257_p0 = pnand %p1256_p12, %p1250_p1 }
  0x36   : > { %1260 = shalt.err (!%p1257_p0)
}
  0x37   : > { %s1520_s30 = smov 128   ;;  %s1521_s11 = smov 8  }
  0x38   : > { %1157 = dma.hbm_to_vmem [thread:$0]  (!%p1638_p11), %s2004_s2, 512, %s1631_s23, [#allocation6], %s1520_s30, %s1520_s30, %s1521_s11  }
  0x39   : > { %s2006_s4 = sld [smem:[#allocation24_spill]] }
  0x3f   : > { %s1261_s29 = scalar_lea.hbm %s2006_s4, 512 }
  0x40   : > { %p1262_p1 = scmp.ne.s32.totalorder %s2006_s4, %s1261_s29  ;;  %p1268_p10 = scmp.lt.u32.totalorder %s1261_s29, %s2006_s4 }
  0x42   : > { %p1264_p2 = pnand %p1262_p1, %p1654_p13 }
  0x44   : > { %p1265_p6 = pneg %p1264_p2 }
  0x46   : > { %p1270_p3 = pnand %p1268_p10, %p1265_p6 }
  0x48   : > { %1273 = shalt.err (!%p1270_p3)
}
  0x49   : > { %s1274_s23 = scalar_lea.vmem %s1642_s26, 512  ;;  %p1282_p12 = scmp.lt.s32.totalorder %s1642_s26, %s1642_s26 }
  0x4a   : > { %p1275_p5 = scmp.ne.s32.totalorder %s1642_s26, %s1274_s23  ;;  %p1283_p0 = scmp.lt.s32.totalorder %s1274_s23, %s1274_s23 }
  0x4c   : > { %p1277_p7 = pnand %p1275_p5, %p1654_p13  ;;  %p1284_p1 = por %p1283_p0, %p1282_p12 }
  0x4e   : > { %p1278_p9 = pneg %p1277_p7 }
  0x50   : > { %p1285_p2 = pnand %p1284_p1, %p1278_p9 }
  0x52   : > { %1288 = shalt.err (!%p1285_p2)
}
  0x53   : > { %1160 = dma.hbm_to_vmem [thread:$0]  (!%p1638_p11), %s2006_s4, 512, %s1642_s26, [#allocation9], %s1520_s30, %s1520_s30, %s1521_s11  }
  0x54   : > { %s2007_s6 = sld [smem:[#allocation25_spill]] }
  0x5a   : > { %s1289_s12 = scalar_lea.hbm %s2007_s6, 2048 }
  0x5b   : > { %p1290_p6 = scmp.ne.s32.totalorder %s2007_s6, %s1289_s12  ;;  %p1296_p5 = scmp.lt.u32.totalorder %s1289_s12, %s2007_s6 }
  0x5d   : > { %p1292_p10 = pnand %p1290_p6, %p1654_p13 }
  0x5f   : > { %p1293_p3 = pneg %p1292_p10 }
  0x61   : > { %p1298_p7 = pnand %p1296_p5, %p1293_p3 }
  0x63   : > { %1301 = shalt.err (!%p1298_p7)
}
  0x64   : > { %s1302_s23 = scalar_lea.vmem %s340_s28, 2048  ;;  %p1310_p1 = scmp.lt.s32.totalorder %s340_s28, %s340_s28 }
  0x65   : > { %p1303_p9 = scmp.ne.s32.totalorder %s340_s28, %s1302_s23  ;;  %p1311_p2 = scmp.lt.s32.totalorder %s1302_s23, %s1302_s23 }
  0x67   : > { %p1305_p12 = pnand %p1303_p9, %p1654_p13  ;;  %p1312_p4 = por %p1311_p2, %p1310_p1 }
  0x69   : > { %p1306_p0 = pneg %p1305_p12 }
  0x6b   : > { %p1313_p8 = pnand %p1312_p4, %p1306_p0 }
  0x6d   : > { %1316 = shalt.err (!%p1313_p8)
}
  0x6e   : > { %1163 = dma.hbm_to_vmem [thread:$0]  (!%p1638_p11), %s2007_s6, 2048, %s340_s28, [#allocation9], %s1520_s30, %s1520_s30, %s1521_s11  }
  0x6f   : > { %s1727_s18 = sadd.s32 1, %s1515_s16   ;;  %s41_s10 = sadd.s32 1, %s1511_s15 }
  0x70   : > { %s38_s24 = ssub.s32 %s1515_s16, %s1727_s18  ;;  %p48_p8 = scmp.ne.s32.totalorder %s1511_s15, %s1507_s14 }
  0x71   : > { %p39_p4 = scmp.eq.s32.totalorder %s38_s24, 0  ;;  %p49_p13 = scmp.eq.s32.totalorder %s1515_s16, 0 }
  0x72   : > { %p1184_p6 = scmp.lt.s32.totalorder %s1515_s16, 2  ;;  %p2008_p3 = scmp.eq.s32.totalorder %s1606_s17, 1 }
  0x73   : > { %s1737_s13 = scalar_select %p39_p4, %s1511_s15, %s41_s10  }
  0x74   : > { %p50_p10 = por %p49_p13, %p48_p8  ;;  %p1741_p5 = por %p2008_p3, %p48_p8 }
  0x75   : > { %s356_s12 = sand.u32 1, %s1511_s15   ;;  %s986_s22 = sshll.u32 %s1515_s16, 7 }
  0x76   : > { %s2009_s20 = scalar_select %p1741_p5, 1, 0 }
  0x77   : > { %s1747_s28 = sshll.u32 %s356_s12, 3  ;;  %s1752_s25 = scalar_lea.hbm %s1974_s0, %s986_s22 }
  0x78   : > { %s360_s27 = scalar_lea.vmem [#allocation2], %s1747_s28  ;;  %p1755_p11 = pnand %p1184_p6, %p50_p10 }
  0x79   : > { %s367_s29 = sshll.u32 %s360_s27, 4  ;;  %s1764_s24 = scalar_lea.hbm %s1975_s1, %s986_s22  ;;  %s1759_s29 = int_to_ptr.vmem [resolvable:$true] %s367_s29 }
  0x7a   : > { %s357_s10 = scalar_lea.sflag [#allocation3], %s356_s12  ;;  %s1317_s30 = scalar_lea.hbm %s1752_s25, 128 }
  0x7b   : > { %p1318_p7 = scmp.ne.s32.totalorder %s1752_s25, %s1317_s30  ;;  %p1319_p9 = pneg %p1755_p11 }
  0x7c   : > { %s1322_s2 = scalar_lea.hbm %s1974_s0, 256  ;;  %p1323_p1 = scmp.lt.u32.totalorder %s1752_s25, %s1974_s0 }
  0x7d   : > { %p1320_p12 = pnand %p1319_p9, %p1318_p7  ;;  %p1324_p2 = scmp.lt.u32.totalorder %s1322_s2, %s1317_s30 }
  0x7e   : > { %p1326_p8 = scmp.lt.u32.totalorder %s1317_s30, %s1752_s25 }
  0x7f   : > { %p1321_p0 = pneg %p1320_p12  ;;  %p1325_p4 = por %p1324_p2, %p1323_p1 }
  0x81   : > { %p1327_p13 = por %p1326_p8, %p1325_p4 }
  0x83   : > { %p1328_p6 = pnand %p1327_p13, %p1321_p0 }
  0x85   : > { %1331 = shalt.err (!%p1328_p6)
}
  0x86   : > { %s1332_s12 = scalar_lea.vmem %s1759_s29, 128  ;;  %s1522_s22 = smov [#allocation2]  }
  0x87   : > { %p1333_p10 = scmp.ne.s32.totalorder %s1759_s29, %s1332_s12  ;;  %s1337_s26 = sshll.u32 %s1522_s22, 4  ;;  %s1338_s26 = int_to_ptr.vmem [resolvable:$false] %s1337_s26 }
  0x88   : > { %s1339_s4 = scalar_lea.vmem %s1338_s26, 256  ;;  %p1340_p12 = scmp.lt.s32.totalorder %s1759_s29, %s1338_s26 }
  0x89   : > { %p1335_p3 = pnand %p1333_p10, %p1319_p9  ;;  %p1341_p1 = scmp.lt.s32.totalorder %s1339_s4, %s1332_s12 }
  0x8b   : > { %p1336_p7 = pneg %p1335_p3  ;;  %p1342_p2 = por %p1341_p1, %p1340_p12 }
  0x8d   : > { %p1343_p4 = pnand %p1342_p2, %p1336_p7 }
  0x8f   : > { %1346 = shalt.err (!%p1343_p4)
}
  0x90   : > { %1167 = dma.hbm_to_vmem [thread:$0]  (!%p1755_p11), %s1752_s25, 128, %s1759_s29, %s357_s10  }
  0x91   : > { %s374_s2 = sand.u32 1, %s1515_s16   ;;  %s378_s6 = scalar_lea.vmem [#allocation5], %s1747_s28 }
  0x92   : > { %s385_s7 = sshll.u32 %s378_s6, 4  ;;  %s375_s30 = scalar_lea.sflag [#allocation6], %s374_s2  ;;  %s386_s7 = int_to_ptr.vmem [resolvable:$true] %s385_s7 }
  0x93   : > { %s1347_s11 = scalar_lea.hbm %s1764_s24, 128  ;;  %s1352_s22 = scalar_lea.hbm %s1975_s1, 256 }
  0x94   : > { %p1348_p0 = scmp.ne.s32.totalorder %s1764_s24, %s1347_s11  ;;  %p1353_p6 = scmp.lt.u32.totalorder %s1764_s24, %s1975_s1 }
  0x95   : > { %p1354_p10 = scmp.lt.u32.totalorder %s1352_s22, %s1347_s11  ;;  %p1356_p7 = scmp.lt.u32.totalorder %s1347_s11, %s1764_s24 }
  0x96   : > { %p1350_p8 = pnand %p1348_p0, %p1319_p9 }
  0x97   : > { %p1355_p3 = por %p1354_p10, %p1353_p6 }
  0x98   : > { %p1351_p13 = pneg %p1350_p8 }
  0x99   : > { %p1357_p12 = por %p1356_p7, %p1355_p3 }
  0x9b   : > { %p1358_p1 = pnand %p1357_p12, %p1351_p13 }
  0x9d   : > { %1361 = shalt.err (!%p1358_p1)
}
  0x9e   : > { %s1362_s28 = scalar_lea.vmem %s386_s7, 128  ;;  %s1523_s25 = smov [#allocation5]  }
  0x9f   : > { %p1363_p2 = scmp.ne.s32.totalorder %s386_s7, %s1362_s28  ;;  %s1367_s29 = sshll.u32 %s1523_s25, 4  ;;  %s1368_s29 = int_to_ptr.vmem [resolvable:$false] %s1367_s29 }
  0xa0   : > { %s1369_s10 = scalar_lea.vmem %s1368_s29, 256  ;;  %p1370_p8 = scmp.lt.s32.totalorder %s386_s7, %s1368_s29 }
  0xa1   : > { %p1365_p4 = pnand %p1363_p2, %p1319_p9  ;;  %p1371_p5 = scmp.lt.s32.totalorder %s1369_s10, %s1362_s28 }
  0xa3   : > { %p1366_p0 = pneg %p1365_p4  ;;  %p1372_p6 = por %p1371_p5, %p1370_p8 }
  0xa5   : > { %p1373_p10 = pnand %p1372_p6, %p1366_p0 }
  0xa7   : > { %1376 = shalt.err (!%p1373_p10)
}
  0xa8   : > { %1170 = dma.hbm_to_vmem [thread:$0]  (!%p1755_p11), %s1764_s24, 128, %s386_s7, %s375_s30  }
  0xa9   : > { %p2011_p13 = scmp.ne.s32.totalorder %s2002_s21, 0 }
  0xaa   : > { %s1815_s2 = sand.u32 (!%p2011_p13), 1, %s1507_s14   ;;  %p2012_p5 = scmp.ne.s32.totalorder (!%p2011_p13), %s1999_s19, 0 }
  0xab   : > { %394 = sbr.rel (%p2011_p13) target bundleno = 669 (0x29d), region = 52  ;;  %s1818_s6 = sshll.u32 (!%p2011_p13), %s1815_s2, 3 }
  0xac   : > { %s397_s11 = scalar_lea.sflag (!%p2011_p13), [#allocation3], %s1815_s2  ;;  %s400_s27 = scalar_lea.vmem (!%p2011_p13), [#allocation2], %s1818_s6 }
  0xb2   : > { %1478 = dma.done.wait (%p2012_p5), %s397_s11, 128  }
  0xb3   : > { %1480 = vsyncadd (%p2012_p5), %s397_s11, 4294967168  ;;  %s405_s21 = sand.u32 1, %s1606_s17   ;;  %s409_s24 = scalar_lea.vmem [#allocation5], %s1818_s6 }
  0xb4   : > { %s406_s23 = scalar_lea.sflag [#allocation6], %s405_s21 }
  0xb5   : > { %1482 = dma.done.wait (%p2012_p5), %s406_s23, 128  }
  0xb6   : > { %1484 = vsyncadd (%p2012_p5), %s406_s23, 4294967168  ;;  %p2013_p11 = scmp.eq.s32.totalorder %s1606_s17, 0 }
  0xb8   : > { %1486 = dma.done.wait (%p2013_p11), [#allocation6], 512   ;;  %p2014_p9 = pmov %p2013_p11 }
  0xba   : > { %1488 = vsyncadd (%p2014_p9), [#allocation6], 4294966784  ;;  %p2015_p3 = pmov %p2014_p9 }
  0xbc   : > { %1490 = dma.done.wait (%p2015_p3), [#allocation9], 2560   ;;  %p2016_p7 = pmov %p2015_p3 }
  0xbd   : > { %v1524_v0 = vmov 0.0|0.0   ;;  %vm1525_vm0 = vmmov 0   ;;  %v1526_v1 = vmov 0.0   ;;  %v475_v2 = vld [vmem:[#allocation7] sm:$0xff]  ;;  %v476_v3 = vld [vmem:[#allocation7 + $0x8] sm:$0xff]  ;;  %v477_v4 = vld [vmem:[#allocation7 + $0x10] sm:$0xff] }
  0xbe   : > { %1492 = vsyncadd (%p2016_p7), [#allocation9], 4294964736  ;;  %1096 = vmatprep.subr.bf16.mxu1 %v1524_v0  ;;  %1047 = vmatprep.mubr.msk.f32.mxu1 %vm1525_vm0, %v1526_v1  ;;  %v1097_v5 = vpack.c.bf16 %v476_v3, %v475_v2  ;;  %v478_v6 = vld [vmem:[#allocation7 + $0x18] sm:$0xff]  ;;  %v560_v8 = vld [vmem:[#allocation8] sm:$0xff]  ;;  %vm486_vm1 = vcmask 261120   ;;  %s458_s30 = scalar_lea.vmem [#allocation11], %s1818_s6 }
  0xbf   : > { %1108 = vmatprep.subr.bf16.mxu0 %v1524_v0  ;;  %1093 = vmatprep.mubr.msk.f32.mxu0 %vm1525_vm0, %v1526_v1  ;;  %v1100_v7 = vpack.c.bf16 %v478_v6, %v477_v4  ;;  %v561_v9 = vld [vmem:[#allocation8 + $0x8] sm:$0xff]  ;;  %v562_v12 = vld [vmem:[#allocation8 + $0x10] sm:$0xff]  ;;  %v563_v13 = vld [vmem:[#allocation8 + $0x18] sm:$0xff]  ;;  %s465_s26 = scalar_lea.vmem [#allocation12], %s1818_s6  ;;  %s1870_s4 = sshll.u32 %s1606_s17, 7 }
  0xc0   : > { %1098 = vmatpush3.bf16.msra.mxu1 %v1097_v5  ;;  %v473_v10 = vld [vmem:[%s400_s27] sm:$0xff]  ;;  %v1103_v11 = vpack.c.bf16 %v561_v9, %v560_v8  ;;  %v1106_v14 = vpack.c.bf16 %v563_v13, %v562_v12  ;;  %v474_v15 = vld [vmem:[%s409_s24] sm:$0xff]  ;;  %s784_s28 = sshll.u32 %s465_s26, 4  ;;  %s1876_s10 = scalar_lea.hbm %s1983_s9, %s1870_s4  ;;  %s785_s28 = int_to_ptr.vmem [resolvable:$true] %s784_s28 }
  0xc1   : > { %1099 = vmatprep.subr.bf16.mxu1 %v1524_v0  ;;  %v651_v16 = vld [vmem:[#allocation10] sm:$0xff]  ;;  %v652_v17 = vld [vmem:[#allocation10 + $0x8] sm:$0xff]  ;;  %v653_v19 = vld [vmem:[#allocation10 + $0x10] sm:$0xff]  ;;  %s1880_s11 = scalar_lea.sflag [#allocation13], %s405_s21  ;;  %s1377_s27 = scalar_lea.vmem %s785_s28, 128 }
  0xc2   : > { %v1109_v18 = vpack.c.bf16 %v652_v17, %v651_v16  ;;  %v654_v20 = vld [vmem:[#allocation10 + $0x18] sm:$0xff]  ;;  %v655_v22 = vld [vmem:[#allocation10 + $0x20] sm:$0xff]  ;;  %v656_v23 = vld [vmem:[#allocation10 + $0x28] sm:$0xff]  ;;  %p1378_p12 = scmp.ne.s32.totalorder %s785_s28, %s1377_s27  ;;  %p2017_p1 = scmp.ne.s32.totalorder %s2009_s20, 0 }
  0xc3   : > { %v1112_v21 = vpack.c.bf16 %v654_v20, %v653_v19  ;;  %v1115_v24 = vpack.c.bf16 %v656_v23, %v655_v22  ;;  %v657_v25 = vld [vmem:[#allocation10 + $0x30] sm:$0xff]  ;;  %v658_v26 = vld [vmem:[#allocation10 + $0x38] sm:$0xff]  ;;  %v659_v28 = vld [vmem:[#allocation10 + $0x40] sm:$0xff]  ;;  %s1527_s23 = smov [#allocation12]  }
  0xc4   : > { %1101 = vmatpush3.bf16.msra.mxu1 %v1100_v7  ;;  %1110 = vmatpush3.bf16.msra.mxu0 %v1109_v18  ;;  %v1118_v27 = vpack.c.bf16 %v658_v26, %v657_v25  ;;  %v660_v29 = vld [vmem:[#allocation10 + $0x48] sm:$0xff]  ;;  %v661_v31 = vld [vmem:[#allocation10 + $0x50] sm:$0xff]  ;;  %v662_v32 = vld [vmem:[#allocation10 + $0x58] sm:$0xff]  ;;  %p1379_p2 = pnand %p1378_p12, %p2017_p1  ;;  %s1381_s24 = sshll.u32 %s1527_s23, 4  ;;  %s1382_s24 = int_to_ptr.vmem [resolvable:$false] %s1381_s24 }
  0xc5   : > { %1102 = vmatprep.subr.bf16.mxu1 %v1524_v0  ;;  %1111 = vmatprep.subr.bf16.mxu0 %v1524_v0  ;;  %v1121_v30 = vpack.c.bf16 %v660_v29, %v659_v28  ;;  %v1124_v33 = vpack.c.bf16 %v662_v32, %v661_v31  ;;  %v663_v34 = vld [vmem:[#allocation10 + $0x60] sm:$0xff]  ;;  %v664_v35 = vld [vmem:[#allocation10 + $0x68] sm:$0xff]  ;;  %v665_v37 = vld [vmem:[#allocation10 + $0x70] sm:$0xff]  ;;  %s1383_s19 = scalar_lea.vmem %s1382_s24, 256  ;;  %p1384_p0 = scmp.lt.s32.totalorder %s785_s28, %s1382_s24 }
  0xc6   : > { %v1127_v36 = vpack.c.bf16 %v664_v35, %v663_v34  ;;  %v666_v38 = vld [vmem:[#allocation10 + $0x78] sm:$0xff]  ;;  %v998_v40 = vld [vmem:[%s1977_s3] ss:$0 sm:$0xff]  ;;  %p1380_p4 = pneg %p1379_p2  ;;  %p1385_p8 = scmp.lt.s32.totalorder %s1383_s19, %s1377_s27 }
  0xc7   : > { %1048 = vmatmul.mubr.msk.f32.vlgmr.msra.gmra.mrb[0].mxu1 %vm486_vm1, %v473_v10  ;;  %v1130_v39 = vpack.c.bf16 %v666_v38, %v665_v37  ;;  %v1000_v45 = vld [vmem:[%s1979_s5] ss:$0 sm:$0xff] }
  0xc8   : > { %1104 = vmatpush3.bf16.msra.mxu1 %v1103_v11  ;;  %1058 = vmatprep.mubr.msk.f32.mxu1 %vm1525_vm0, %v1526_v1  ;;  %p1386_p6 = por %p1385_p8, %p1384_p0 }
  0xc9   : > { %1105 = vmatprep.subr.bf16.mxu1 %v1524_v0  ;;  %1113 = vmatpush3.bf16.msra.mxu0 %v1112_v21 }
  0xca   : > { %1114 = vmatprep.subr.bf16.mxu0 %v1524_v0  ;;  %p1387_p10 = pnand %p1386_p6, %p1380_p4 }
  0xcc   : > { %1107 = vmatpush3.bf16.msra.mxu1 %v1106_v14 }
  0xcd   : > { %1116 = vmatpush3.bf16.msra.mxu0 %v1115_v24 }
  0xce   : > { %1117 = vmatprep.subr.bf16.mxu0 %v1524_v0 }
  0xcf   : > { %1059 = vmatmul.mubr.msk.f32.vlgmr.msra.gmra.mrb[2].mxu1 %vm486_vm1, %v474_v15 }
  0xd1   : > { %1119 = vmatpush3.bf16.msra.mxu0 %v1118_v27 }
  0xd2   : > { %1120 = vmatprep.subr.bf16.mxu0 %v1524_v0 }
  0xd5   : > { %1122 = vmatpush3.bf16.msra.mxu0 %v1121_v30 }
  0xd6   : > { %1123 = vmatprep.subr.bf16.mxu0 %v1524_v0 }
  0xd9   : > { %1125 = vmatpush3.bf16.msra.mxu0 %v1124_v33 }
  0xda   : > { %1126 = vmatprep.subr.bf16.mxu0 %v1524_v0 }
  0xdd   : > { %1128 = vmatpush3.bf16.msra.mxu0 %v1127_v36 }
  0xde   : > { %1129 = vmatprep.subr.bf16.mxu0 %v1524_v0 }
  0xe1   : > { %1131 = vmatpush3.bf16.msra.mxu0 %v1130_v39 }
 0x19a   : > { %v556_v41 = vpop.f32.mrb[0].mxu1 }
 0x19b   : > { %v557_v42 = vadd.f32 %v998_v40, %v556_v41  ;;  %v1049_v43 = vpop.f32.mrb[1].mxu1 }
 0x19d   : > { %v1002_v44 = vmul.f32 -1.442695, %v557_v42  ;;  %744 = vst [vmem:[%s458_s30] sm:$0xff] %v557_v42 }
 0x19f   : > { %1229 = vpow2.f32 %v1002_v44 }
 0x1a2   : > { %v640_v46 = vpop.f32.mrb[2].mxu1 }
 0x1a3   : > { %v641_v47 = vadd.f32 %v1000_v45, %v640_v46  ;;  %v1060_v48 = vpop.f32.mrb[3].mxu1 }
 0x1a5   : > { %745 = vst [vmem:[%s465_s26] sm:$0xff] %v641_v47 }
 0x1a9   : > { %v1230_v49 = vpop.eup %1229 }
 0x1aa   : > { %v647_v50 = vadd.f32 1.0, %v1230_v49 }
 0x1ac   : > { %1231 = vrcp.f32 %v647_v50 }
 0x1b6   : > { %v1232_v51 = vpop.eup %1231 }
 0x1b7   : > { %v650_v52 = vmul.f32 %v1232_v51, %v641_v47 }
 0x1b9   : > { %1094 = vmatmul.mubr.f32.vlgmr.msra.gmra.mrb[0].mxu0 %v650_v52 }
 0x1ba   : > { %1390 = shalt.err (!%p1387_p10)
}
 0x1bb   : > { %s1391_s17 = scalar_lea.hbm %s1876_s10, 128  ;;  %s1395_s12 = scalar_lea.hbm %s1983_s9, 256 }
 0x1bc   : > { %p1392_p13 = scmp.ne.s32.totalorder %s1876_s10, %s1391_s17  ;;  %p1396_p9 = scmp.lt.u32.totalorder %s1876_s10, %s1983_s9 }
 0x1bd   : > { %p1397_p3 = scmp.lt.u32.totalorder %s1395_s12, %s1391_s17  ;;  %p1399_p12 = scmp.lt.u32.totalorder %s1391_s17, %s1876_s10 }
 0x1be   : > { %p1393_p5 = pnand %p1392_p13, %p2017_p1 }
 0x1bf   : > { %p1398_p7 = por %p1397_p3, %p1396_p9 }
 0x1c0   : > { %p1394_p11 = pneg %p1393_p5 }
 0x1c1   : > { %p1400_p2 = por %p1399_p12, %p1398_p7 }
 0x1c3   : > { %p1401_p4 = pnand %p1400_p2, %p1394_p11 }
 0x1c5   : > { %1404 = shalt.err (!%p1401_p4)
}
 0x1c6   : > { %1149 = dma.vmem_to_hbm [thread:$0]  (%p2017_p1), %s785_s28, 128, %s1876_s10, %s1880_s11  }
 0x1c7   : > { %s1904_s27 = scalar_lea.hbm %s1982_s8, %s1870_s4  ;;  %s771_s23 = sshll.u32 %s458_s30, 4  ;;  %s772_s23 = int_to_ptr.vmem [resolvable:$true] %s771_s23 }
 0x1c8   : > { %s748_s24 = scalar_lea.sflag [#allocation4], %s1815_s2  ;;  %s1405_s19 = scalar_lea.vmem %s772_s23, 128 }
 0x1c9   : > { %p1406_p0 = scmp.ne.s32.totalorder %s772_s23, %s1405_s19  ;;  %s1528_s17 = smov [#allocation11]  }
 0x1ca   : > { %s1409_s21 = sshll.u32 %s1528_s17, 4  ;;  %s1410_s21 = int_to_ptr.vmem [resolvable:$false] %s1409_s21 }
 0x1cb   : > { %p1407_p8 = pnand %p1406_p0, %p2017_p1  ;;  %s1411_s7 = scalar_lea.vmem %s1410_s21, 256 }
 0x1cc   : > { %p1412_p10 = scmp.lt.s32.totalorder %s772_s23, %s1410_s21  ;;  %p1413_p13 = scmp.lt.s32.totalorder %s1411_s7, %s1405_s19 }
 0x1cd   : > { %p1408_p6 = pneg %p1407_p8 }
 0x1ce   : > { %p1414_p5 = por %p1413_p13, %p1412_p10 }
 0x1d0   : > { %p1415_p11 = pnand %p1414_p5, %p1408_p6 }
 0x1d2   : > { %1418 = shalt.err (!%p1415_p11)
}
 0x1d3   : > { %s1419_s2 = scalar_lea.hbm %s1904_s27, 128  ;;  %s1423_s10 = scalar_lea.hbm %s1982_s8, 256 }
 0x1d4   : > { %p1420_p9 = scmp.ne.s32.totalorder %s1904_s27, %s1419_s2  ;;  %p1424_p12 = scmp.lt.u32.totalorder %s1904_s27, %s1982_s8 }
 0x1d5   : > { %p1425_p2 = scmp.lt.u32.totalorder %s1423_s10, %s1419_s2  ;;  %p1427_p0 = scmp.lt.u32.totalorder %s1419_s2, %s1904_s27 }
 0x1d6   : > { %p1421_p3 = pnand %p1420_p9, %p2017_p1 }
 0x1d7   : > { %p1426_p4 = por %p1425_p2, %p1424_p12 }
 0x1d8   : > { %p1422_p7 = pneg %p1421_p3 }
 0x1d9   : > { %p1428_p8 = por %p1427_p0, %p1426_p4 }
 0x1db   : > { %p1429_p6 = pnand %p1428_p8, %p1422_p7 }
 0x1dd   : > { %1432 = shalt.err (!%p1429_p6)
}
 0x1de   : > { %1148 = dma.vmem_to_hbm [thread:$0]  (%p2017_p1), %s772_s23, 128, %s1904_s27, %s748_s24  }
 0x1df   : > { %s2018_s29 = sld [smem:[#allocation26_spill]]  ;;  %s472_s19 = scalar_lea.vmem [#allocation14], %s1818_s6 }
 0x1e0   : > { %s797_s17 = sshll.u32 %s472_s19, 4  ;;  %s2019_s2 = sld [smem:[#allocation27_spill]]  ;;  %s798_s17 = int_to_ptr.vmem [resolvable:$true] %s797_s17 }
 0x1e1   : > { %s1433_s28 = scalar_lea.vmem %s798_s17, 128  ;;  %s1529_s27 = smov [#allocation14]  }
 0x1e2   : > { %p1434_p10 = scmp.ne.s32.totalorder %s798_s17, %s1433_s28  ;;  %s1437_s23 = sshll.u32 %s1529_s27, 4  ;;  %s1438_s23 = int_to_ptr.vmem [resolvable:$false] %s1437_s23 }
 0x1e3   : > { %s1439_s6 = scalar_lea.vmem %s1438_s23, 256  ;;  %p1440_p11 = scmp.lt.s32.totalorder %s798_s17, %s1438_s23 }
 0x1e4   : > { %p1435_p13 = pnand %p1434_p10, %p2017_p1  ;;  %p1441_p9 = scmp.lt.s32.totalorder %s1439_s6, %s1433_s28 }
 0x1e5   : > { %v1003_v53 = vld [vmem:[%s2018_s29] ss:$0 sm:$0xff] }
 0x1e6   : > { %s1934_s30 = scalar_lea.hbm %s2019_s2, %s1870_s4  ;;  %p1436_p5 = pneg %p1435_p13 }
 0x1e7   : > { %p1442_p3 = por %p1441_p9, %p1440_p11 }
 0x1e9   : > { %p1443_p7 = pnand %p1442_p3, %p1436_p5 }
 0x28c   : > { %v740_v54 = vpop.f32.mrb[0].mxu0 }
 0x28d   : > { %v741_v55 = vadd.f32 %v1003_v53, %v740_v54  ;;  %v1095_v56 = vpop.f32.mrb[1].mxu0 }
 0x28f   : > { %746 = vst [vmem:[%s472_s19] sm:$0xff] %v741_v55 }
 0x290   : > { %1446 = shalt.err (!%p1443_p7)
}
 0x291   : > { %s1447_s4 = scalar_lea.hbm %s1934_s30, 128  ;;  %s1451_s12 = scalar_lea.hbm %s2019_s2, 256 }
 0x292   : > { %p1448_p12 = scmp.ne.s32.totalorder %s1934_s30, %s1447_s4  ;;  %p1452_p0 = scmp.lt.u32.totalorder %s1934_s30, %s2019_s2 }
 0x293   : > { %p1453_p8 = scmp.lt.u32.totalorder %s1451_s12, %s1447_s4  ;;  %p1455_p10 = scmp.lt.u32.totalorder %s1447_s4, %s1934_s30 }
 0x294   : > { %p1449_p2 = pnand %p1448_p12, %p2017_p1 }
 0x295   : > { %p1454_p6 = por %p1453_p8, %p1452_p0 }
 0x296   : > { %p1450_p4 = pneg %p1449_p2 }
 0x297   : > { %p1456_p13 = por %p1455_p10, %p1454_p6 }
 0x299   : > { %p1457_p5 = pnand %p1456_p13, %p1450_p4 }
 0x29b   : > { %1460 = shalt.err (!%p1457_p5)
}
 0x29c   : > { %1150 = dma.vmem_to_hbm [thread:$0]  (%p2017_p1), %s798_s17, 128, %s1934_s30, %s1880_s11  }
 0x29d PF: > { %s2020_s25 = sld [smem:[#allocation21_spill]]  ;;  %s2021_s29 = sld [smem:[#allocation22_spill]] }
 0x29e   : > { %p2023_p9 = scmp.ge.s32.totalorder %s1515_s16, 2 }
 0x2a3   : > { %s809_s19 = sand.u32 1, %s2020_s25   ;;  %p2022_p11 = scmp.ne.s32.totalorder %s2021_s29, 0 }
 0x2a4   : > { %s810_s21 = scalar_lea.sflag [#allocation4], %s809_s19 }
 0x2a5   : > { %p1172_p3 = pnand %p2023_p9, %p2022_p11 }
 0x2a7   : > { %1494 = dma.done.wait (!%p1172_p3), %s810_s21, 128  }
 0x2a8   : > { %1496 = vsyncadd (!%p1172_p3), %s810_s21, 4294967168  ;;  %s2024_s7 = sadd.s32 4294967294, %s1515_s16  }
 0x2a9   : > { %s818_s28 = sand.u32 1, %s2024_s7  }
 0x2aa   : > { %s819_s27 = scalar_lea.sflag [#allocation13], %s818_s28 }
 0x2ab   : > { %1498 = dma.done.wait (!%p1172_p3), %s819_s27, 256  }
 0x2ac   : > { %1500 = vsyncadd (!%p1172_p3), %s819_s27, 4294967040  ;;  %s2025_s20 = smov %s1737_s13  ;;  %p31_p1 = scmp.ge.s32.totalorder %s1727_s18, 4  }
 0x2ad   : > { %s2026_s13 = smov %s1507_s14  ;;  %s2027_s14 = smov %s1511_s15 }
 0x2ae   : > { %s2028_s15 = smov %s2025_s20  ;;  %s2029_s16 = smov %s1727_s18 }
 0x2af   :  { %33 = sbr.rel (!%p31_p1) target bundleno = 16 (0x10), region = 154 }
 0x2b6   :  { %833 = vsyncpa [#allocation3], 1 }
 0x2b7   :  { %835 = vsyncpa [#allocation3 + $0x1], 1 }
 0x2b8   :  { %836 = vsyncpa [#allocation6], 1 }
 0x2b9   :  { %838 = vsyncpa [#allocation6 + $0x1], 1 }
 0x2ba   :  { %839 = vsyncpa [#allocation9], 1 }
 0x2bb   :  { %840 = vsyncpa [#allocation4], 1 }
 0x2bc   :  { %842 = vsyncpa [#allocation4 + $0x1], 1 }
 0x2bd   :  { %843 = vsyncpa [#allocation13], 1 }
 0x2be   :  { %845 = vsyncpa [#allocation13 + $0x1], 1 }

</bundles_post_ra>
